<compile_context>
chip_gen: v7x
topology: tpu7x:2x2x1
jax: 0.10.0
libtpu: 0.0.40
codegen_flags: <defaults>
</compile_context>

<pallas_src>
import jax
import jax.numpy as jnp
from jax.experimental import pallas as pl
from jax.experimental.pallas import tpu as pltpu


# ---------------------------------------------------------------------------
# Fused kernel: all layers (skew-interleaved) + head, in-kernel unrolled loop.
# PyTorch gate order in the packed weights is [r, z, n]:
#   r = sigmoid(W_ir x + b_ir + W_hr h + b_hr)
#   z = sigmoid(W_iz x + b_iz + W_hz h + b_hz)
#   n = tanh  (W_in x + b_in + r * (W_hn h + b_hn))
#   h = (1 - z) * n + z * h
# Each gate occupies a full 128-lane block (zero-padded beyond H); only the
# first H lanes of h ever enter a matmul.
# ---------------------------------------------------------------------------
def _make_fused_kernel(T, BP, H, HP, num_layers):
    L = num_layers

    def kernel(*refs):
        x_ref = refs[0]
        w_head_ref = refs[1 + 4 * L]
        b_head_ref = refs[2 + 4 * L]
        o_ref = refs[3 + 4 * L]
        hseq_ref = refs[4 + 4 * L]       # VMEM scratch (T*BP, HP): last-layer h
        xg0_ref = refs[5 + 4 * L]        # VMEM scratch (T*BP, 3*HP): layer-0 proj

        wih = lambda l: refs[1 + 4 * l]  # (K_l, 3*HP)
        whh = lambda l: refs[2 + 4 * l]  # (H,   3*HP)   -- K not padded
        bx = lambda l: refs[3 + 4 * l]   # (1,   3*HP)   b_ih (+ b_hh for r,z)
        bhn = lambda l: refs[4 + 4 * l]  # (1,   HP)     b_hn

        # Hoisted layer-0 input projection: one big matmul, off the serial
        # path; parked in scratch so the recurrence only holds one step live.
        xg0_ref[...] = (jnp.dot(x_ref[...], wih(0)[...],
                                preferred_element_type=jnp.float32)
                        + bx(0)[...])

        # Broadcasts hoisted once (not once per unrolled step).
        bhn_b = [jnp.broadcast_to(bhn(l)[...], (BP, HP)) for l in range(L)]
        bx_b = [None] + [jnp.broadcast_to(bx(l)[...], (BP, 3 * HP))
                         for l in range(1, L)]

        def gru_cell(xg, h, whh_v, bhn_v):
            # K = H contraction; padded lanes of h never enter the MXU.
            hg = jnp.dot(h[:, :H], whh_v, preferred_element_type=jnp.float32)
            rz = jax.nn.sigmoid(xg[:, :2 * HP] + hg[:, :2 * HP])   # lane-aligned
            r = rz[:, :HP]
            z = rz[:, HP:]
            n = jnp.tanh(xg[:, 2 * HP:] + r * (hg[:, 2 * HP:] + bhn_v))
            return (1.0 - z) * n + z * h

        h = [jnp.zeros((BP, HP), jnp.float32) for _ in range(L)]

        # Skewed software pipeline over layers: at global step s, layer l runs
        # timestep t = s - l.  Layer l's input is layer l-1's output produced
        # at global step s-1, so the L chains are independent within a step.
        for s in range(T + L - 1):
            h_in = list(h)                           # snapshot of step-(s-1) states
            for l in range(L):
                t = s - l
                if 0 <= t < T:
                    if l == 0:
                        xg = xg0_ref[t * BP:(t + 1) * BP, :]       # cheap vld
                    else:
                        # Per-step projection of the layer below's fresh output;
                        # independent of both recurrent chains' latest values.
                        xg = jnp.dot(h_in[l - 1][:, :H], wih(l)[...],
                                     preferred_element_type=jnp.float32) + bx_b[l]
                    # NOTE: relies on Mosaic latching the identical W_hh RHS
                    # across unrolled steps; pltpu.matmul_push_rhs would make
                    # the residency explicit if a bundle dump shows re-pushes.
                    h[l] = gru_cell(xg, h_in[l], whh(l)[...], bhn_b[l])
                    if l == L - 1:
                        hseq_ref[t * BP:(t + 1) * BP, :] = h[l]

        # Lane-dense head: (T*BP, H) @ (H, OP) + b ; real logits in lanes 0:2.
        o_ref[...] = (jnp.dot(hseq_ref[...][:, :H], w_head_ref[...],
                              preferred_element_type=jnp.float32)
                      + b_head_ref[...])

    return kernel


# ---------------------------------------------------------------------------
# Wrapper: parameter packing / padding (plain JAX glue) + pallas_call.
# ---------------------------------------------------------------------------
def gru_model_forward(x_bti, params, *, hp=128, op=128):
    x = x_bti.astype(jnp.float32)
    B, T, I = x.shape
    num_layers = len(params["gru_layers"])
    H = params["gru_layers"][0][1].shape[1]          # whh: (3H, H)
    n_out = params["out_w"].shape[0]

    assert H <= hp and H % 8 == 0, f"hidden_size={H} must be 8-aligned and <= {hp}"
    assert n_out <= op, f"out features {n_out} > lane block {op}"

    BP = ((B + 7) // 8) * 8                          # sublane-pad batch to >= 8
    IP = ((I + 7) // 8) * 8                          # 8-align layer-0 K dim

    flat_inputs = []

    # x: (B,T,I) -> time-major, batch/K padded, flattened to (T*BP, IP).
    x_t = jnp.transpose(x, (1, 0, 2))
    x_t = jnp.pad(x_t, ((0, 0), (0, BP - B), (0, IP - I)))
    flat_inputs.append(x_t.reshape(T * BP, IP))

    for l, (wih, whh, bih, bhh) in enumerate(params["gru_layers"]):
        k_in = IP if l == 0 else H                   # NO zero-padding of K to 128
        wih_g, whh_g, bx_g = [], [], []
        for g in range(3):
            wg = wih[g * H:(g + 1) * H, :].T                     # (K_real, H)
            wg = jnp.pad(wg, ((0, k_in - wg.shape[0]), (0, hp - H)))
            wih_g.append(wg)

            ug = whh[g * H:(g + 1) * H, :].T                     # (H, H)
            whh_g.append(jnp.pad(ug, ((0, 0), (0, hp - H))))     # lane pad only

            b = bih[g * H:(g + 1) * H]
            if g < 2:                                            # fold b_hh into r,z
                b = b + bhh[g * H:(g + 1) * H]
            bx_g.append(jnp.pad(b, (0, hp - H)))

        flat_inputs.append(jnp.concatenate(wih_g, axis=1))                # (K_l, 3*HP)
        flat_inputs.append(jnp.concatenate(whh_g, axis=1))                # (H,   3*HP)
        flat_inputs.append(jnp.concatenate(bx_g).reshape(1, 3 * hp))      # (1,   3*HP)
        flat_inputs.append(jnp.pad(bhh[2 * H:3 * H],
                                   (0, hp - H)).reshape(1, hp))           # (1,   HP)

    w_head = jnp.pad(params["out_w"].T, ((0, 0), (0, op - n_out)))        # (H, OP)
    b_head = jnp.pad(params["out_b"], (0, op - n_out)).reshape(1, op)     # (1, OP)
    flat_inputs += [w_head, b_head]

    kernel = _make_fused_kernel(T, BP, H, hp, num_layers)
    out = pl.pallas_call(
        kernel,
        out_shape=jax.ShapeDtypeStruct((T * BP, op), jnp.float32),
        grid_spec=pltpu.PrefetchScalarGridSpec(
            num_scalar_prefetch=0,
            grid=(1,),
            in_specs=[pl.BlockSpec(a.shape, lambda i: (0, 0)) for a in flat_inputs],
            out_specs=pl.BlockSpec((T * BP, op), lambda i: (0, 0)),
            scratch_shapes=[pltpu.VMEM((T * BP, hp), jnp.float32),
                            pltpu.VMEM((T * BP, 3 * hp), jnp.float32)],
        ),
        compiler_params=pltpu.CompilerParams(
            dimension_semantics=("arbitrary",)),     # single sequential invocation
    )(*flat_inputs)

    out = out.reshape(T, BP, op)[:, :B, :n_out]      # strip batch / lane padding
    return jnp.transpose(out, (1, 0, 2))             # (B, T, 2)


# ---------------------------------------------------------------------------
# Parameter init mirroring nn.GRU / nn.Linear layouts.
# ---------------------------------------------------------------------------
def init_params(key, input_size, hidden_size, num_layers):
    params = {"gru_layers": []}
    k = 1.0 / jnp.sqrt(hidden_size)
    for layer in range(num_layers):
        in_sz = input_size if layer == 0 else hidden_size
        key, k1, k2, k3, k4 = jax.random.split(key, 5)
        wih = jax.random.uniform(k1, (3 * hidden_size, in_sz), jnp.float32, -k, k)
        whh = jax.random.uniform(k2, (3 * hidden_size, hidden_size), jnp.float32, -k, k)
        bih = jax.random.uniform(k3, (3 * hidden_size,), jnp.float32, -k, k)
        bhh = jax.random.uniform(k4, (3 * hidden_size,), jnp.float32, -k, k)
        params["gru_layers"].append((wih, whh, bih, bhh))
    key, k1, k2 = jax.random.split(key, 3)
    kl = 1.0 / jnp.sqrt(hidden_size)
    params["out_w"] = jax.random.uniform(k1, (2, hidden_size), jnp.float32, -kl, kl)
    params["out_b"] = jax.random.uniform(k2, (2,), jnp.float32, -kl, kl)
    return params


# Pure-JAX reference (lax.scan) used only for in-script verification.
def gru_model_reference(x_bti, params):
    x = x_bti.astype(jnp.float32)
    h_seq = jnp.transpose(x, (1, 0, 2))
    for (wih, whh, bih, bhh) in params["gru_layers"]:
        H = whh.shape[1]

        def step(h, x_t, wih=wih, whh=whh, bih=bih, bhh=bhh, H=H):
            xg = x_t @ wih.T + bih
            hg = h @ whh.T + bhh
            r = jax.nn.sigmoid(xg[:, :H] + hg[:, :H])
            z = jax.nn.sigmoid(xg[:, H:2 * H] + hg[:, H:2 * H])
            n = jnp.tanh(xg[:, 2 * H:] + r * hg[:, 2 * H:])
            h_new = (1.0 - z) * n + z * h
            return h_new, h_new

        h0 = jnp.zeros((x.shape[0], H), jnp.float32)
        _, h_seq = jax.lax.scan(step, h0, h_seq)
    out = h_seq @ params["out_w"].T + params["out_b"]
    return out.transpose(1, 0, 2)


if __name__ == "__main__":
    # args.INPUT_SIZE=16, args.HIDDEN_SIZE=32, args.LAYER_NUM=2
    INPUT_SIZE, HIDDEN_SIZE, LAYER_NUM = 16, 32, 2
    B, T = 2, 8

    key = jax.random.PRNGKey(0)
    key, pkey, xkey = jax.random.split(key, 3)
    params = init_params(pkey, INPUT_SIZE, HIDDEN_SIZE, LAYER_NUM)
    x = jax.random.normal(xkey, (B, T, INPUT_SIZE), jnp.float32)

    out = gru_model_forward(x, params)
    out = jax.block_until_ready(out)

    ref = gru_model_reference(x, params)
    assert out.shape == (B, T, 2), out.shape
    assert jnp.allclose(out, ref, atol=1e-5, rtol=1e-5), \
        float(jnp.max(jnp.abs(out - ref)))

    print("KERNEL_OK")
</pallas_src>

<mosaic_0001>
module attributes {stable_mosaic.version = 11 : i64} {
  func.func @kernel(%arg0: i32, %arg1: memref<64x16xf32, #tpu.memory_space<vmem>>, %arg2: memref<16x384xf32, #tpu.memory_space<vmem>>, %arg3: memref<32x384xf32, #tpu.memory_space<vmem>>, %arg4: memref<1x384xf32, #tpu.memory_space<vmem>>, %arg5: memref<1x128xf32, #tpu.memory_space<vmem>>, %arg6: memref<32x384xf32, #tpu.memory_space<vmem>>, %arg7: memref<32x384xf32, #tpu.memory_space<vmem>>, %arg8: memref<1x384xf32, #tpu.memory_space<vmem>>, %arg9: memref<1x128xf32, #tpu.memory_space<vmem>>, %arg10: memref<32x128xf32, #tpu.memory_space<vmem>>, %arg11: memref<1x128xf32, #tpu.memory_space<vmem>>, %arg12: memref<64x128xf32, #tpu.memory_space<vmem>>, %arg13: memref<64x128xf32, #tpu.memory_space<vmem>>, %arg14: memref<64x384xf32, #tpu.memory_space<vmem>>) attributes {dimension_semantics = [#tpu.dimension_semantics<arbitrary>], iteration_bounds = array<i64: 1>, scalar_prefetch = 0 : i64, scratch_operands = 2 : i64, tpu.core_type = #tpu.core_type<tc>, window_params = [{pipeline_mode = #tpu.pipeline_mode<synchronous>, transform_indices = @transform_0, window_bounds = array<i64: 64, 16>}, {pipeline_mode = #tpu.pipeline_mode<synchronous>, transform_indices = @transform_1, window_bounds = array<i64: 16, 384>}, {pipeline_mode = #tpu.pipeline_mode<synchronous>, transform_indices = @transform_2, window_bounds = array<i64: 32, 384>}, {pipeline_mode = #tpu.pipeline_mode<synchronous>, transform_indices = @transform_3, window_bounds = array<i64: 1, 384>}, {pipeline_mode = #tpu.pipeline_mode<synchronous>, transform_indices = @transform_4, window_bounds = array<i64: 1, 128>}, {pipeline_mode = #tpu.pipeline_mode<synchronous>, transform_indices = @transform_5, window_bounds = array<i64: 32, 384>}, {pipeline_mode = #tpu.pipeline_mode<synchronous>, transform_indices = @transform_6, window_bounds = array<i64: 32, 384>}, {pipeline_mode = #tpu.pipeline_mode<synchronous>, transform_indices = @transform_7, window_bounds = array<i64: 1, 384>}, {pipeline_mode = #tpu.pipeline_mode<synchronous>, transform_indices = @transform_8, window_bounds = array<i64: 1, 128>}, {pipeline_mode = #tpu.pipeline_mode<synchronous>, transform_indices = @transform_9, window_bounds = array<i64: 32, 128>}, {pipeline_mode = #tpu.pipeline_mode<synchronous>, transform_indices = @transform_10, window_bounds = array<i64: 1, 128>}, {pipeline_mode = #tpu.pipeline_mode<synchronous>, transform_indices = @transform_11, window_bounds = array<i64: 64, 128>}]} {
    %c0 = arith.constant 0 : index
    %c0_0 = arith.constant 0 : index
    %0 = vector.load %arg1[%c0, %c0_0] : memref<64x16xf32, #tpu.memory_space<vmem>>, vector<64x16xf32>
    %c0_1 = arith.constant 0 : index
    %c0_2 = arith.constant 0 : index
    %1 = vector.load %arg2[%c0_1, %c0_2] : memref<16x384xf32, #tpu.memory_space<vmem>>, vector<16x384xf32>
    %cst = arith.constant dense<0.000000e+00> : vector<64x384xf32>
    %2 = tpu.matmul %0, %1, %cst {dimension_numbers = #tpu.dot_dimension_numbers<[1], [0], [0], [1], [0, 0, 1, 1], [], []>} : vector<64x16xf32>, vector<16x384xf32>, vector<64x384xf32> -> vector<64x384xf32>
    %c0_3 = arith.constant 0 : index
    %c0_4 = arith.constant 0 : index
    %3 = vector.load %arg4[%c0_3, %c0_4] : memref<1x384xf32, #tpu.memory_space<vmem>>, vector<1x384xf32>
    %4 = vector.broadcast %3 : vector<1x384xf32> to vector<64x384xf32>
    %5 = arith.addf %2, %4 : vector<64x384xf32>
    %c0_5 = arith.constant 0 : index
    %c0_6 = arith.constant 0 : index
    %6 = vector.load %arg14[%c0_5, %c0_6] : memref<64x384xf32, #tpu.memory_space<vmem>>, vector<64x384xf32>
    tpu.vector_store %arg14[%c0_5, %c0_6], %5 {strides = array<i32>} : memref<64x384xf32, #tpu.memory_space<vmem>>, vector<64x384xf32>,
    %c0_7 = arith.constant 0 : index
    %c0_8 = arith.constant 0 : index
    %7 = vector.load %arg5[%c0_7, %c0_8] : memref<1x128xf32, #tpu.memory_space<vmem>>, vector<1x128xf32>
    %8 = vector.shape_cast %7 : vector<1x128xf32> to vector<1x128xf32>
    %9 = vector.broadcast %8 : vector<1x128xf32> to vector<8x128xf32>
    %c0_9 = arith.constant 0 : index
    %c0_10 = arith.constant 0 : index
    %10 = vector.load %arg9[%c0_9, %c0_10] : memref<1x128xf32, #tpu.memory_space<vmem>>, vector<1x128xf32>
    %11 = vector.shape_cast %10 : vector<1x128xf32> to vector<1x128xf32>
    %12 = vector.broadcast %11 : vector<1x128xf32> to vector<8x128xf32>
    %c0_11 = arith.constant 0 : index
    %c0_12 = arith.constant 0 : index
    %13 = vector.load %arg8[%c0_11, %c0_12] : memref<1x384xf32, #tpu.memory_space<vmem>>, vector<1x384xf32>
    %14 = vector.shape_cast %13 : vector<1x384xf32> to vector<1x384xf32>
    %15 = vector.broadcast %14 : vector<1x384xf32> to vector<8x384xf32>
    %cst_13 = arith.constant 0.000000e+00 : f32
    %16 = vector.broadcast %cst_13 : f32 to vector<8x128xf32>
    %cst_14 = arith.constant 0.000000e+00 : f32
    %17 = vector.broadcast %cst_14 : f32 to vector<8x128xf32>
    %c0_15 = arith.constant 0 : index
    %c0_16 = arith.constant 0 : index
    %18 = vector.load %arg14[%c0_15, %c0_16] : memref<64x384xf32, #tpu.memory_space<vmem>>, vector<8x384xf32>
    %c0_17 = arith.constant 0 : index
    %c0_18 = arith.constant 0 : index
    %19 = vector.load %arg3[%c0_17, %c0_18] : memref<32x384xf32, #tpu.memory_space<vmem>>, vector<32x384xf32>
    %20 = vector.extract_strided_slice %16 {offsets = [0, 0], sizes = [8, 32], strides = [1, 1]} : vector<8x128xf32> to vector<8x32xf32>
    %cst_19 = arith.constant dense<0.000000e+00> : vector<8x384xf32>
    %21 = tpu.matmul %20, %19, %cst_19 {dimension_numbers = #tpu.dot_dimension_numbers<[1], [0], [0], [1], [0, 0, 1, 1], [], []>} : vector<8x32xf32>, vector<32x384xf32>, vector<8x384xf32> -> vector<8x384xf32>
    %22 = vector.extract_strided_slice %18 {offsets = [0, 0], sizes = [8, 256], strides = [1, 1]} : vector<8x384xf32> to vector<8x256xf32>
    %23 = vector.extract_strided_slice %21 {offsets = [0, 0], sizes = [8, 256], strides = [1, 1]} : vector<8x384xf32> to vector<8x256xf32>
    %24 = arith.addf %22, %23 : vector<8x256xf32>
    %25 = arith.negf %24 : vector<8x256xf32>
    %26 = math.exp %25 : vector<8x256xf32>
    %cst_20 = arith.constant 1.000000e+00 : f32
    %27 = vector.broadcast %cst_20 : f32 to vector<8x256xf32>
    %28 = arith.addf %27, %26 : vector<8x256xf32>
    %29 = arith.divf %27, %28 : vector<8x256xf32>
    %30 = vector.extract_strided_slice %29 {offsets = [0, 0], sizes = [8, 128], strides = [1, 1]} : vector<8x256xf32> to vector<8x128xf32>
    %31 = vector.extract_strided_slice %29 {offsets = [0, 128], sizes = [8, 128], strides = [1, 1]} : vector<8x256xf32> to vector<8x128xf32>
    %32 = vector.extract_strided_slice %18 {offsets = [0, 256], sizes = [8, 128], strides = [1, 1]} : vector<8x384xf32> to vector<8x128xf32>
    %33 = vector.extract_strided_slice %21 {offsets = [0, 256], sizes = [8, 128], strides = [1, 1]} : vector<8x384xf32> to vector<8x128xf32>
    %34 = arith.addf %33, %9 : vector<8x128xf32>
    %35 = arith.mulf %30, %34 : vector<8x128xf32>
    %36 = arith.addf %32, %35 : vector<8x128xf32>
    %37 = math.tanh %36 : vector<8x128xf32>
    %cst_21 = arith.constant 1.000000e+00 : f32
    %38 = vector.broadcast %cst_21 : f32 to vector<8x128xf32>
    %39 = arith.subf %38, %31 : vector<8x128xf32>
    %40 = arith.mulf %39, %37 : vector<8x128xf32>
    %41 = arith.mulf %31, %16 : vector<8x128xf32>
    %42 = arith.addf %40, %41 : vector<8x128xf32>
    %c8 = arith.constant 8 : index
    %c0_22 = arith.constant 0 : index
    %43 = vector.load %arg14[%c8, %c0_22] : memref<64x384xf32, #tpu.memory_space<vmem>>, vector<8x384xf32>
    %c0_23 = arith.constant 0 : index
    %c0_24 = arith.constant 0 : index
    %44 = vector.load %arg3[%c0_23, %c0_24] : memref<32x384xf32, #tpu.memory_space<vmem>>, vector<32x384xf32>
    %45 = vector.extract_strided_slice %42 {offsets = [0, 0], sizes = [8, 32], strides = [1, 1]} : vector<8x128xf32> to vector<8x32xf32>
    %cst_25 = arith.constant dense<0.000000e+00> : vector<8x384xf32>
    %46 = tpu.matmul %45, %44, %cst_25 {dimension_numbers = #tpu.dot_dimension_numbers<[1], [0], [0], [1], [0, 0, 1, 1], [], []>} : vector<8x32xf32>, vector<32x384xf32>, vector<8x384xf32> -> vector<8x384xf32>
    %47 = vector.extract_strided_slice %43 {offsets = [0, 0], sizes = [8, 256], strides = [1, 1]} : vector<8x384xf32> to vector<8x256xf32>
    %48 = vector.extract_strided_slice %46 {offsets = [0, 0], sizes = [8, 256], strides = [1, 1]} : vector<8x384xf32> to vector<8x256xf32>
    %49 = arith.addf %47, %48 : vector<8x256xf32>
    %50 = arith.negf %49 : vector<8x256xf32>
    %51 = math.exp %50 : vector<8x256xf32>
    %cst_26 = arith.constant 1.000000e+00 : f32
    %52 = vector.broadcast %cst_26 : f32 to vector<8x256xf32>
    %53 = arith.addf %52, %51 : vector<8x256xf32>
    %54 = arith.divf %52, %53 : vector<8x256xf32>
    %55 = vector.extract_strided_slice %54 {offsets = [0, 0], sizes = [8, 128], strides = [1, 1]} : vector<8x256xf32> to vector<8x128xf32>
    %56 = vector.extract_strided_slice %54 {offsets = [0, 128], sizes = [8, 128], strides = [1, 1]} : vector<8x256xf32> to vector<8x128xf32>
    %57 = vector.extract_strided_slice %43 {offsets = [0, 256], sizes = [8, 128], strides = [1, 1]} : vector<8x384xf32> to vector<8x128xf32>
    %58 = vector.extract_strided_slice %46 {offsets = [0, 256], sizes = [8, 128], strides = [1, 1]} : vector<8x384xf32> to vector<8x128xf32>
    %59 = arith.addf %58, %9 : vector<8x128xf32>
    %60 = arith.mulf %55, %59 : vector<8x128xf32>
    %61 = arith.addf %57, %60 : vector<8x128xf32>
    %62 = math.tanh %61 : vector<8x128xf32>
    %cst_27 = arith.constant 1.000000e+00 : f32
    %63 = vector.broadcast %cst_27 : f32 to vector<8x128xf32>
    %64 = arith.subf %63, %56 : vector<8x128xf32>
    %65 = arith.mulf %64, %62 : vector<8x128xf32>
    %66 = arith.mulf %56, %42 : vector<8x128xf32>
    %67 = arith.addf %65, %66 : vector<8x128xf32>
    %68 = vector.extract_strided_slice %42 {offsets = [0, 0], sizes = [8, 32], strides = [1, 1]} : vector<8x128xf32> to vector<8x32xf32>
    %c0_28 = arith.constant 0 : index
    %c0_29 = arith.constant 0 : index
    %69 = vector.load %arg6[%c0_28, %c0_29] : memref<32x384xf32, #tpu.memory_space<vmem>>, vector<32x384xf32>
    %cst_30 = arith.constant dense<0.000000e+00> : vector<8x384xf32>
    %70 = tpu.matmul %68, %69, %cst_30 {dimension_numbers = #tpu.dot_dimension_numbers<[1], [0], [0], [1], [0, 0, 1, 1], [], []>} : vector<8x32xf32>, vector<32x384xf32>, vector<8x384xf32> -> vector<8x384xf32>
    %71 = arith.addf %70, %15 : vector<8x384xf32>
    %c0_31 = arith.constant 0 : index
    %c0_32 = arith.constant 0 : index
    %72 = vector.load %arg7[%c0_31, %c0_32] : memref<32x384xf32, #tpu.memory_space<vmem>>, vector<32x384xf32>
    %73 = vector.extract_strided_slice %17 {offsets = [0, 0], sizes = [8, 32], strides = [1, 1]} : vector<8x128xf32> to vector<8x32xf32>
    %cst_33 = arith.constant dense<0.000000e+00> : vector<8x384xf32>
    %74 = tpu.matmul %73, %72, %cst_33 {dimension_numbers = #tpu.dot_dimension_numbers<[1], [0], [0], [1], [0, 0, 1, 1], [], []>} : vector<8x32xf32>, vector<32x384xf32>, vector<8x384xf32> -> vector<8x384xf32>
    %75 = vector.extract_strided_slice %71 {offsets = [0, 0], sizes = [8, 256], strides = [1, 1]} : vector<8x384xf32> to vector<8x256xf32>
    %76 = vector.extract_strided_slice %74 {offsets = [0, 0], sizes = [8, 256], strides = [1, 1]} : vector<8x384xf32> to vector<8x256xf32>
    %77 = arith.addf %75, %76 : vector<8x256xf32>
    %78 = arith.negf %77 : vector<8x256xf32>
    %79 = math.exp %78 : vector<8x256xf32>
    %cst_34 = arith.constant 1.000000e+00 : f32
    %80 = vector.broadcast %cst_34 : f32 to vector<8x256xf32>
    %81 = arith.addf %80, %79 : vector<8x256xf32>
    %82 = arith.divf %80, %81 : vector<8x256xf32>
    %83 = vector.extract_strided_slice %82 {offsets = [0, 0], sizes = [8, 128], strides = [1, 1]} : vector<8x256xf32> to vector<8x128xf32>
    %84 = vector.extract_strided_slice %82 {offsets = [0, 128], sizes = [8, 128], strides = [1, 1]} : vector<8x256xf32> to vector<8x128xf32>
    %85 = vector.extract_strided_slice %71 {offsets = [0, 256], sizes = [8, 128], strides = [1, 1]} : vector<8x384xf32> to vector<8x128xf32>
    %86 = vector.extract_strided_slice %74 {offsets = [0, 256], sizes = [8, 128], strides = [1, 1]} : vector<8x384xf32> to vector<8x128xf32>
    %87 = arith.addf %86, %12 : vector<8x128xf32>
    %88 = arith.mulf %83, %87 : vector<8x128xf32>
    %89 = arith.addf %85, %88 : vector<8x128xf32>
    %90 = math.tanh %89 : vector<8x128xf32>
    %cst_35 = arith.constant 1.000000e+00 : f32
    %91 = vector.broadcast %cst_35 : f32 to vector<8x128xf32>
    %92 = arith.subf %91, %84 : vector<8x128xf32>
    %93 = arith.mulf %92, %90 : vector<8x128xf32>
    %94 = arith.mulf %84, %17 : vector<8x128xf32>
    %95 = arith.addf %93, %94 : vector<8x128xf32>
    %c0_36 = arith.constant 0 : index
    %c0_37 = arith.constant 0 : index
    %96 = vector.load %arg13[%c0_36, %c0_37] : memref<64x128xf32, #tpu.memory_space<vmem>>, vector<8x128xf32>
    tpu.vector_store %arg13[%c0_36, %c0_37], %95 {strides = array<i32>} : memref<64x128xf32, #tpu.memory_space<vmem>>, vector<8x128xf32>,
    %c16 = arith.constant 16 : index
    %c0_38 = arith.constant 0 : index
    %97 = vector.load %arg14[%c16, %c0_38] : memref<64x384xf32, #tpu.memory_space<vmem>>, vector<8x384xf32>
    %c0_39 = arith.constant 0 : index
    %c0_40 = arith.constant 0 : index
    %98 = vector.load %arg3[%c0_39, %c0_40] : memref<32x384xf32, #tpu.memory_space<vmem>>, vector<32x384xf32>
    %99 = vector.extract_strided_slice %67 {offsets = [0, 0], sizes = [8, 32], strides = [1, 1]} : vector<8x128xf32> to vector<8x32xf32>
    %cst_41 = arith.constant dense<0.000000e+00> : vector<8x384xf32>
    %100 = tpu.matmul %99, %98, %cst_41 {dimension_numbers = #tpu.dot_dimension_numbers<[1], [0], [0], [1], [0, 0, 1, 1], [], []>} : vector<8x32xf32>, vector<32x384xf32>, vector<8x384xf32> -> vector<8x384xf32>
    %101 = vector.extract_strided_slice %97 {offsets = [0, 0], sizes = [8, 256], strides = [1, 1]} : vector<8x384xf32> to vector<8x256xf32>
    %102 = vector.extract_strided_slice %100 {offsets = [0, 0], sizes = [8, 256], strides = [1, 1]} : vector<8x384xf32> to vector<8x256xf32>
    %103 = arith.addf %101, %102 : vector<8x256xf32>
    %104 = arith.negf %103 : vector<8x256xf32>
    %105 = math.exp %104 : vector<8x256xf32>
    %cst_42 = arith.constant 1.000000e+00 : f32
    %106 = vector.broadcast %cst_42 : f32 to vector<8x256xf32>
    %107 = arith.addf %106, %105 : vector<8x256xf32>
    %108 = arith.divf %106, %107 : vector<8x256xf32>
    %109 = vector.extract_strided_slice %108 {offsets = [0, 0], sizes = [8, 128], strides = [1, 1]} : vector<8x256xf32> to vector<8x128xf32>
    %110 = vector.extract_strided_slice %108 {offsets = [0, 128], sizes = [8, 128], strides = [1, 1]} : vector<8x256xf32> to vector<8x128xf32>
    %111 = vector.extract_strided_slice %97 {offsets = [0, 256], sizes = [8, 128], strides = [1, 1]} : vector<8x384xf32> to vector<8x128xf32>
    %112 = vector.extract_strided_slice %100 {offsets = [0, 256], sizes = [8, 128], strides = [1, 1]} : vector<8x384xf32> to vector<8x128xf32>
    %113 = arith.addf %112, %9 : vector<8x128xf32>
    %114 = arith.mulf %109, %113 : vector<8x128xf32>
    %115 = arith.addf %111, %114 : vector<8x128xf32>
    %116 = math.tanh %115 : vector<8x128xf32>
    %cst_43 = arith.constant 1.000000e+00 : f32
    %117 = vector.broadcast %cst_43 : f32 to vector<8x128xf32>
    %118 = arith.subf %117, %110 : vector<8x128xf32>
    %119 = arith.mulf %118, %116 : vector<8x128xf32>
    %120 = arith.mulf %110, %67 : vector<8x128xf32>
    %121 = arith.addf %119, %120 : vector<8x128xf32>
    %122 = vector.extract_strided_slice %67 {offsets = [0, 0], sizes = [8, 32], strides = [1, 1]} : vector<8x128xf32> to vector<8x32xf32>
    %c0_44 = arith.constant 0 : index
    %c0_45 = arith.constant 0 : index
    %123 = vector.load %arg6[%c0_44, %c0_45] : memref<32x384xf32, #tpu.memory_space<vmem>>, vector<32x384xf32>
    %cst_46 = arith.constant dense<0.000000e+00> : vector<8x384xf32>
    %124 = tpu.matmul %122, %123, %cst_46 {dimension_numbers = #tpu.dot_dimension_numbers<[1], [0], [0], [1], [0, 0, 1, 1], [], []>} : vector<8x32xf32>, vector<32x384xf32>, vector<8x384xf32> -> vector<8x384xf32>
    %125 = arith.addf %124, %15 : vector<8x384xf32>
    %c0_47 = arith.constant 0 : index
    %c0_48 = arith.constant 0 : index
    %126 = vector.load %arg7[%c0_47, %c0_48] : memref<32x384xf32, #tpu.memory_space<vmem>>, vector<32x384xf32>
    %127 = vector.extract_strided_slice %95 {offsets = [0, 0], sizes = [8, 32], strides = [1, 1]} : vector<8x128xf32> to vector<8x32xf32>
    %cst_49 = arith.constant dense<0.000000e+00> : vector<8x384xf32>
    %128 = tpu.matmul %127, %126, %cst_49 {dimension_numbers = #tpu.dot_dimension_numbers<[1], [0], [0], [1], [0, 0, 1, 1], [], []>} : vector<8x32xf32>, vector<32x384xf32>, vector<8x384xf32> -> vector<8x384xf32>
    %129 = vector.extract_strided_slice %125 {offsets = [0, 0], sizes = [8, 256], strides = [1, 1]} : vector<8x384xf32> to vector<8x256xf32>
    %130 = vector.extract_strided_slice %128 {offsets = [0, 0], sizes = [8, 256], strides = [1, 1]} : vector<8x384xf32> to vector<8x256xf32>
    %131 = arith.addf %129, %130 : vector<8x256xf32>
    %132 = arith.negf %131 : vector<8x256xf32>
    %133 = math.exp %132 : vector<8x256xf32>
    %cst_50 = arith.constant 1.000000e+00 : f32
    %134 = vector.broadcast %cst_50 : f32 to vector<8x256xf32>
    %135 = arith.addf %134, %133 : vector<8x256xf32>
    %136 = arith.divf %134, %135 : vector<8x256xf32>
    %137 = vector.extract_strided_slice %136 {offsets = [0, 0], sizes = [8, 128], strides = [1, 1]} : vector<8x256xf32> to vector<8x128xf32>
    %138 = vector.extract_strided_slice %136 {offsets = [0, 128], sizes = [8, 128], strides = [1, 1]} : vector<8x256xf32> to vector<8x128xf32>
    %139 = vector.extract_strided_slice %125 {offsets = [0, 256], sizes = [8, 128], strides = [1, 1]} : vector<8x384xf32> to vector<8x128xf32>
    %140 = vector.extract_strided_slice %128 {offsets = [0, 256], sizes = [8, 128], strides = [1, 1]} : vector<8x384xf32> to vector<8x128xf32>
    %141 = arith.addf %140, %12 : vector<8x128xf32>
    %142 = arith.mulf %137, %141 : vector<8x128xf32>
    %143 = arith.addf %139, %142 : vector<8x128xf32>
    %144 = math.tanh %143 : vector<8x128xf32>
    %cst_51 = arith.constant 1.000000e+00 : f32
    %145 = vector.broadcast %cst_51 : f32 to vector<8x128xf32>
    %146 = arith.subf %145, %138 : vector<8x128xf32>
    %147 = arith.mulf %146, %144 : vector<8x128xf32>
    %148 = arith.mulf %138, %95 : vector<8x128xf32>
    %149 = arith.addf %147, %148 : vector<8x128xf32>
    %c8_52 = arith.constant 8 : index
    %c0_53 = arith.constant 0 : index
    %150 = vector.load %arg13[%c8_52, %c0_53] : memref<64x128xf32, #tpu.memory_space<vmem>>, vector<8x128xf32>
    tpu.vector_store %arg13[%c8_52, %c0_53], %149 {strides = array<i32>} : memref<64x128xf32, #tpu.memory_space<vmem>>, vector<8x128xf32>,
    %c24 = arith.constant 24 : index
    %c0_54 = arith.constant 0 : index
    %151 = vector.load %arg14[%c24, %c0_54] : memref<64x384xf32, #tpu.memory_space<vmem>>, vector<8x384xf32>
    %c0_55 = arith.constant 0 : index
    %c0_56 = arith.constant 0 : index
    %152 = vector.load %arg3[%c0_55, %c0_56] : memref<32x384xf32, #tpu.memory_space<vmem>>, vector<32x384xf32>
    %153 = vector.extract_strided_slice %121 {offsets = [0, 0], sizes = [8, 32], strides = [1, 1]} : vector<8x128xf32> to vector<8x32xf32>
    %cst_57 = arith.constant dense<0.000000e+00> : vector<8x384xf32>
    %154 = tpu.matmul %153, %152, %cst_57 {dimension_numbers = #tpu.dot_dimension_numbers<[1], [0], [0], [1], [0, 0, 1, 1], [], []>} : vector<8x32xf32>, vector<32x384xf32>, vector<8x384xf32> -> vector<8x384xf32>
    %155 = vector.extract_strided_slice %151 {offsets = [0, 0], sizes = [8, 256], strides = [1, 1]} : vector<8x384xf32> to vector<8x256xf32>
    %156 = vector.extract_strided_slice %154 {offsets = [0, 0], sizes = [8, 256], strides = [1, 1]} : vector<8x384xf32> to vector<8x256xf32>
    %157 = arith.addf %155, %156 : vector<8x256xf32>
    %158 = arith.negf %157 : vector<8x256xf32>
    %159 = math.exp %158 : vector<8x256xf32>
    %cst_58 = arith.constant 1.000000e+00 : f32
    %160 = vector.broadcast %cst_58 : f32 to vector<8x256xf32>
    %161 = arith.addf %160, %159 : vector<8x256xf32>
    %162 = arith.divf %160, %161 : vector<8x256xf32>
    %163 = vector.extract_strided_slice %162 {offsets = [0, 0], sizes = [8, 128], strides = [1, 1]} : vector<8x256xf32> to vector<8x128xf32>
    %164 = vector.extract_strided_slice %162 {offsets = [0, 128], sizes = [8, 128], strides = [1, 1]} : vector<8x256xf32> to vector<8x128xf32>
    %165 = vector.extract_strided_slice %151 {offsets = [0, 256], sizes = [8, 128], strides = [1, 1]} : vector<8x384xf32> to vector<8x128xf32>
    %166 = vector.extract_strided_slice %154 {offsets = [0, 256], sizes = [8, 128], strides = [1, 1]} : vector<8x384xf32> to vector<8x128xf32>
    %167 = arith.addf %166, %9 : vector<8x128xf32>
    %168 = arith.mulf %163, %167 : vector<8x128xf32>
    %169 = arith.addf %165, %168 : vector<8x128xf32>
    %170 = math.tanh %169 : vector<8x128xf32>
    %cst_59 = arith.constant 1.000000e+00 : f32
    %171 = vector.broadcast %cst_59 : f32 to vector<8x128xf32>
    %172 = arith.subf %171, %164 : vector<8x128xf32>
    %173 = arith.mulf %172, %170 : vector<8x128xf32>
    %174 = arith.mulf %164, %121 : vector<8x128xf32>
    %175 = arith.addf %173, %174 : vector<8x128xf32>
    %176 = vector.extract_strided_slice %121 {offsets = [0, 0], sizes = [8, 32], strides = [1, 1]} : vector<8x128xf32> to vector<8x32xf32>
    %c0_60 = arith.constant 0 : index
    %c0_61 = arith.constant 0 : index
    %177 = vector.load %arg6[%c0_60, %c0_61] : memref<32x384xf32, #tpu.memory_space<vmem>>, vector<32x384xf32>
    %cst_62 = arith.constant dense<0.000000e+00> : vector<8x384xf32>
    %178 = tpu.matmul %176, %177, %cst_62 {dimension_numbers = #tpu.dot_dimension_numbers<[1], [0], [0], [1], [0, 0, 1, 1], [], []>} : vector<8x32xf32>, vector<32x384xf32>, vector<8x384xf32> -> vector<8x384xf32>
    %179 = arith.addf %178, %15 : vector<8x384xf32>
    %c0_63 = arith.constant 0 : index
    %c0_64 = arith.constant 0 : index
    %180 = vector.load %arg7[%c0_63, %c0_64] : memref<32x384xf32, #tpu.memory_space<vmem>>, vector<32x384xf32>
    %181 = vector.extract_strided_slice %149 {offsets = [0, 0], sizes = [8, 32], strides = [1, 1]} : vector<8x128xf32> to vector<8x32xf32>
    %cst_65 = arith.constant dense<0.000000e+00> : vector<8x384xf32>
    %182 = tpu.matmul %181, %180, %cst_65 {dimension_numbers = #tpu.dot_dimension_numbers<[1], [0], [0], [1], [0, 0, 1, 1], [], []>} : vector<8x32xf32>, vector<32x384xf32>, vector<8x384xf32> -> vector<8x384xf32>
    %183 = vector.extract_strided_slice %179 {offsets = [0, 0], sizes = [8, 256], strides = [1, 1]} : vector<8x384xf32> to vector<8x256xf32>
    %184 = vector.extract_strided_slice %182 {offsets = [0, 0], sizes = [8, 256], strides = [1, 1]} : vector<8x384xf32> to vector<8x256xf32>
    %185 = arith.addf %183, %184 : vector<8x256xf32>
    %186 = arith.negf %185 : vector<8x256xf32>
    %187 = math.exp %186 : vector<8x256xf32>
    %cst_66 = arith.constant 1.000000e+00 : f32
    %188 = vector.broadcast %cst_66 : f32 to vector<8x256xf32>
    %189 = arith.addf %188, %187 : vector<8x256xf32>
    %190 = arith.divf %188, %189 : vector<8x256xf32>
    %191 = vector.extract_strided_slice %190 {offsets = [0, 0], sizes = [8, 128], strides = [1, 1]} : vector<8x256xf32> to vector<8x128xf32>
    %192 = vector.extract_strided_slice %190 {offsets = [0, 128], sizes = [8, 128], strides = [1, 1]} : vector<8x256xf32> to vector<8x128xf32>
    %193 = vector.extract_strided_slice %179 {offsets = [0, 256], sizes = [8, 128], strides = [1, 1]} : vector<8x384xf32> to vector<8x128xf32>
    %194 = vector.extract_strided_slice %182 {offsets = [0, 256], sizes = [8, 128], strides = [1, 1]} : vector<8x384xf32> to vector<8x128xf32>
    %195 = arith.addf %194, %12 : vector<8x128xf32>
    %196 = arith.mulf %191, %195 : vector<8x128xf32>
    %197 = arith.addf %193, %196 : vector<8x128xf32>
    %198 = math.tanh %197 : vector<8x128xf32>
    %cst_67 = arith.constant 1.000000e+00 : f32
    %199 = vector.broadcast %cst_67 : f32 to vector<8x128xf32>
    %200 = arith.subf %199, %192 : vector<8x128xf32>
    %201 = arith.mulf %200, %198 : vector<8x128xf32>
    %202 = arith.mulf %192, %149 : vector<8x128xf32>
    %203 = arith.addf %201, %202 : vector<8x128xf32>
    %c16_68 = arith.constant 16 : index
    %c0_69 = arith.constant 0 : index
    %204 = vector.load %arg13[%c16_68, %c0_69] : memref<64x128xf32, #tpu.memory_space<vmem>>, vector<8x128xf32>
    tpu.vector_store %arg13[%c16_68, %c0_69], %203 {strides = array<i32>} : memref<64x128xf32, #tpu.memory_space<vmem>>, vector<8x128xf32>,
    %c32 = arith.constant 32 : index
    %c0_70 = arith.constant 0 : index
    %205 = vector.load %arg14[%c32, %c0_70] : memref<64x384xf32, #tpu.memory_space<vmem>>, vector<8x384xf32>
    %c0_71 = arith.constant 0 : index
    %c0_72 = arith.constant 0 : index
    %206 = vector.load %arg3[%c0_71, %c0_72] : memref<32x384xf32, #tpu.memory_space<vmem>>, vector<32x384xf32>
    %207 = vector.extract_strided_slice %175 {offsets = [0, 0], sizes = [8, 32], strides = [1, 1]} : vector<8x128xf32> to vector<8x32xf32>
    %cst_73 = arith.constant dense<0.000000e+00> : vector<8x384xf32>
    %208 = tpu.matmul %207, %206, %cst_73 {dimension_numbers = #tpu.dot_dimension_numbers<[1], [0], [0], [1], [0, 0, 1, 1], [], []>} : vector<8x32xf32>, vector<32x384xf32>, vector<8x384xf32> -> vector<8x384xf32>
    %209 = vector.extract_strided_slice %205 {offsets = [0, 0], sizes = [8, 256], strides = [1, 1]} : vector<8x384xf32> to vector<8x256xf32>
    %210 = vector.extract_strided_slice %208 {offsets = [0, 0], sizes = [8, 256], strides = [1, 1]} : vector<8x384xf32> to vector<8x256xf32>
    %211 = arith.addf %209, %210 : vector<8x256xf32>
    %212 = arith.negf %211 : vector<8x256xf32>
    %213 = math.exp %212 : vector<8x256xf32>
    %cst_74 = arith.constant 1.000000e+00 : f32
    %214 = vector.broadcast %cst_74 : f32 to vector<8x256xf32>
    %215 = arith.addf %214, %213 : vector<8x256xf32>
    %216 = arith.divf %214, %215 : vector<8x256xf32>
    %217 = vector.extract_strided_slice %216 {offsets = [0, 0], sizes = [8, 128], strides = [1, 1]} : vector<8x256xf32> to vector<8x128xf32>
    %218 = vector.extract_strided_slice %216 {offsets = [0, 128], sizes = [8, 128], strides = [1, 1]} : vector<8x256xf32> to vector<8x128xf32>
    %219 = vector.extract_strided_slice %205 {offsets = [0, 256], sizes = [8, 128], strides = [1, 1]} : vector<8x384xf32> to vector<8x128xf32>
    %220 = vector.extract_strided_slice %208 {offsets = [0, 256], sizes = [8, 128], strides = [1, 1]} : vector<8x384xf32> to vector<8x128xf32>
    %221 = arith.addf %220, %9 : vector<8x128xf32>
    %222 = arith.mulf %217, %221 : vector<8x128xf32>
    %223 = arith.addf %219, %222 : vector<8x128xf32>
    %224 = math.tanh %223 : vector<8x128xf32>
    %cst_75 = arith.constant 1.000000e+00 : f32
    %225 = vector.broadcast %cst_75 : f32 to vector<8x128xf32>
    %226 = arith.subf %225, %218 : vector<8x128xf32>
    %227 = arith.mulf %226, %224 : vector<8x128xf32>
    %228 = arith.mulf %218, %175 : vector<8x128xf32>
    %229 = arith.addf %227, %228 : vector<8x128xf32>
    %230 = vector.extract_strided_slice %175 {offsets = [0, 0], sizes = [8, 32], strides = [1, 1]} : vector<8x128xf32> to vector<8x32xf32>
    %c0_76 = arith.constant 0 : index
    %c0_77 = arith.constant 0 : index
    %231 = vector.load %arg6[%c0_76, %c0_77] : memref<32x384xf32, #tpu.memory_space<vmem>>, vector<32x384xf32>
    %cst_78 = arith.constant dense<0.000000e+00> : vector<8x384xf32>
    %232 = tpu.matmul %230, %231, %cst_78 {dimension_numbers = #tpu.dot_dimension_numbers<[1], [0], [0], [1], [0, 0, 1, 1], [], []>} : vector<8x32xf32>, vector<32x384xf32>, vector<8x384xf32> -> vector<8x384xf32>
    %233 = arith.addf %232, %15 : vector<8x384xf32>
    %c0_79 = arith.constant 0 : index
    %c0_80 = arith.constant 0 : index
    %234 = vector.load %arg7[%c0_79, %c0_80] : memref<32x384xf32, #tpu.memory_space<vmem>>, vector<32x384xf32>
    %235 = vector.extract_strided_slice %203 {offsets = [0, 0], sizes = [8, 32], strides = [1, 1]} : vector<8x128xf32> to vector<8x32xf32>
    %cst_81 = arith.constant dense<0.000000e+00> : vector<8x384xf32>
    %236 = tpu.matmul %235, %234, %cst_81 {dimension_numbers = #tpu.dot_dimension_numbers<[1], [0], [0], [1], [0, 0, 1, 1], [], []>} : vector<8x32xf32>, vector<32x384xf32>, vector<8x384xf32> -> vector<8x384xf32>
    %237 = vector.extract_strided_slice %233 {offsets = [0, 0], sizes = [8, 256], strides = [1, 1]} : vector<8x384xf32> to vector<8x256xf32>
    %238 = vector.extract_strided_slice %236 {offsets = [0, 0], sizes = [8, 256], strides = [1, 1]} : vector<8x384xf32> to vector<8x256xf32>
    %239 = arith.addf %237, %238 : vector<8x256xf32>
    %240 = arith.negf %239 : vector<8x256xf32>
    %241 = math.exp %240 : vector<8x256xf32>
    %cst_82 = arith.constant 1.000000e+00 : f32
    %242 = vector.broadcast %cst_82 : f32 to vector<8x256xf32>
    %243 = arith.addf %242, %241 : vector<8x256xf32>
    %244 = arith.divf %242, %243 : vector<8x256xf32>
    %245 = vector.extract_strided_slice %244 {offsets = [0, 0], sizes = [8, 128], strides = [1, 1]} : vector<8x256xf32> to vector<8x128xf32>
    %246 = vector.extract_strided_slice %244 {offsets = [0, 128], sizes = [8, 128], strides = [1, 1]} : vector<8x256xf32> to vector<8x128xf32>
    %247 = vector.extract_strided_slice %233 {offsets = [0, 256], sizes = [8, 128], strides = [1, 1]} : vector<8x384xf32> to vector<8x128xf32>
    %248 = vector.extract_strided_slice %236 {offsets = [0, 256], sizes = [8, 128], strides = [1, 1]} : vector<8x384xf32> to vector<8x128xf32>
    %249 = arith.addf %248, %12 : vector<8x128xf32>
    %250 = arith.mulf %245, %249 : vector<8x128xf32>
    %251 = arith.addf %247, %250 : vector<8x128xf32>
    %252 = math.tanh %251 : vector<8x128xf32>
    %cst_83 = arith.constant 1.000000e+00 : f32
    %253 = vector.broadcast %cst_83 : f32 to vector<8x128xf32>
    %254 = arith.subf %253, %246 : vector<8x128xf32>
    %255 = arith.mulf %254, %252 : vector<8x128xf32>
    %256 = arith.mulf %246, %203 : vector<8x128xf32>
    %257 = arith.addf %255, %256 : vector<8x128xf32>
    %c24_84 = arith.constant 24 : index
    %c0_85 = arith.constant 0 : index
    %258 = vector.load %arg13[%c24_84, %c0_85] : memref<64x128xf32, #tpu.memory_space<vmem>>, vector<8x128xf32>
    tpu.vector_store %arg13[%c24_84, %c0_85], %257 {strides = array<i32>} : memref<64x128xf32, #tpu.memory_space<vmem>>, vector<8x128xf32>,
    %c40 = arith.constant 40 : index
    %c0_86 = arith.constant 0 : index
    %259 = vector.load %arg14[%c40, %c0_86] : memref<64x384xf32, #tpu.memory_space<vmem>>, vector<8x384xf32>
    %c0_87 = arith.constant 0 : index
    %c0_88 = arith.constant 0 : index
    %260 = vector.load %arg3[%c0_87, %c0_88] : memref<32x384xf32, #tpu.memory_space<vmem>>, vector<32x384xf32>
    %261 = vector.extract_strided_slice %229 {offsets = [0, 0], sizes = [8, 32], strides = [1, 1]} : vector<8x128xf32> to vector<8x32xf32>
    %cst_89 = arith.constant dense<0.000000e+00> : vector<8x384xf32>
    %262 = tpu.matmul %261, %260, %cst_89 {dimension_numbers = #tpu.dot_dimension_numbers<[1], [0], [0], [1], [0, 0, 1, 1], [], []>} : vector<8x32xf32>, vector<32x384xf32>, vector<8x384xf32> -> vector<8x384xf32>
    %263 = vector.extract_strided_slice %259 {offsets = [0, 0], sizes = [8, 256], strides = [1, 1]} : vector<8x384xf32> to vector<8x256xf32>
    %264 = vector.extract_strided_slice %262 {offsets = [0, 0], sizes = [8, 256], strides = [1, 1]} : vector<8x384xf32> to vector<8x256xf32>
    %265 = arith.addf %263, %264 : vector<8x256xf32>
    %266 = arith.negf %265 : vector<8x256xf32>
    %267 = math.exp %266 : vector<8x256xf32>
    %cst_90 = arith.constant 1.000000e+00 : f32
    %268 = vector.broadcast %cst_90 : f32 to vector<8x256xf32>
    %269 = arith.addf %268, %267 : vector<8x256xf32>
    %270 = arith.divf %268, %269 : vector<8x256xf32>
    %271 = vector.extract_strided_slice %270 {offsets = [0, 0], sizes = [8, 128], strides = [1, 1]} : vector<8x256xf32> to vector<8x128xf32>
    %272 = vector.extract_strided_slice %270 {offsets = [0, 128], sizes = [8, 128], strides = [1, 1]} : vector<8x256xf32> to vector<8x128xf32>
    %273 = vector.extract_strided_slice %259 {offsets = [0, 256], sizes = [8, 128], strides = [1, 1]} : vector<8x384xf32> to vector<8x128xf32>
    %274 = vector.extract_strided_slice %262 {offsets = [0, 256], sizes = [8, 128], strides = [1, 1]} : vector<8x384xf32> to vector<8x128xf32>
    %275 = arith.addf %274, %9 : vector<8x128xf32>
    %276 = arith.mulf %271, %275 : vector<8x128xf32>
    %277 = arith.addf %273, %276 : vector<8x128xf32>
    %278 = math.tanh %277 : vector<8x128xf32>
    %cst_91 = arith.constant 1.000000e+00 : f32
    %279 = vector.broadcast %cst_91 : f32 to vector<8x128xf32>
    %280 = arith.subf %279, %272 : vector<8x128xf32>
    %281 = arith.mulf %280, %278 : vector<8x128xf32>
    %282 = arith.mulf %272, %229 : vector<8x128xf32>
    %283 = arith.addf %281, %282 : vector<8x128xf32>
    %284 = vector.extract_strided_slice %229 {offsets = [0, 0], sizes = [8, 32], strides = [1, 1]} : vector<8x128xf32> to vector<8x32xf32>
    %c0_92 = arith.constant 0 : index
    %c0_93 = arith.constant 0 : index
    %285 = vector.load %arg6[%c0_92, %c0_93] : memref<32x384xf32, #tpu.memory_space<vmem>>, vector<32x384xf32>
    %cst_94 = arith.constant dense<0.000000e+00> : vector<8x384xf32>
    %286 = tpu.matmul %284, %285, %cst_94 {dimension_numbers = #tpu.dot_dimension_numbers<[1], [0], [0], [1], [0, 0, 1, 1], [], []>} : vector<8x32xf32>, vector<32x384xf32>, vector<8x384xf32> -> vector<8x384xf32>
    %287 = arith.addf %286, %15 : vector<8x384xf32>
    %c0_95 = arith.constant 0 : index
    %c0_96 = arith.constant 0 : index
    %288 = vector.load %arg7[%c0_95, %c0_96] : memref<32x384xf32, #tpu.memory_space<vmem>>, vector<32x384xf32>
    %289 = vector.extract_strided_slice %257 {offsets = [0, 0], sizes = [8, 32], strides = [1, 1]} : vector<8x128xf32> to vector<8x32xf32>
    %cst_97 = arith.constant dense<0.000000e+00> : vector<8x384xf32>
    %290 = tpu.matmul %289, %288, %cst_97 {dimension_numbers = #tpu.dot_dimension_numbers<[1], [0], [0], [1], [0, 0, 1, 1], [], []>} : vector<8x32xf32>, vector<32x384xf32>, vector<8x384xf32> -> vector<8x384xf32>
    %291 = vector.extract_strided_slice %287 {offsets = [0, 0], sizes = [8, 256], strides = [1, 1]} : vector<8x384xf32> to vector<8x256xf32>
    %292 = vector.extract_strided_slice %290 {offsets = [0, 0], sizes = [8, 256], strides = [1, 1]} : vector<8x384xf32> to vector<8x256xf32>
    %293 = arith.addf %291, %292 : vector<8x256xf32>
    %294 = arith.negf %293 : vector<8x256xf32>
    %295 = math.exp %294 : vector<8x256xf32>
    %cst_98 = arith.constant 1.000000e+00 : f32
    %296 = vector.broadcast %cst_98 : f32 to vector<8x256xf32>
    %297 = arith.addf %296, %295 : vector<8x256xf32>
    %298 = arith.divf %296, %297 : vector<8x256xf32>
    %299 = vector.extract_strided_slice %298 {offsets = [0, 0], sizes = [8, 128], strides = [1, 1]} : vector<8x256xf32> to vector<8x128xf32>
    %300 = vector.extract_strided_slice %298 {offsets = [0, 128], sizes = [8, 128], strides = [1, 1]} : vector<8x256xf32> to vector<8x128xf32>
    %301 = vector.extract_strided_slice %287 {offsets = [0, 256], sizes = [8, 128], strides = [1, 1]} : vector<8x384xf32> to vector<8x128xf32>
    %302 = vector.extract_strided_slice %290 {offsets = [0, 256], sizes = [8, 128], strides = [1, 1]} : vector<8x384xf32> to vector<8x128xf32>
    %303 = arith.addf %302, %12 : vector<8x128xf32>
    %304 = arith.mulf %299, %303 : vector<8x128xf32>
    %305 = arith.addf %301, %304 : vector<8x128xf32>
    %306 = math.tanh %305 : vector<8x128xf32>
    %cst_99 = arith.constant 1.000000e+00 : f32
    %307 = vector.broadcast %cst_99 : f32 to vector<8x128xf32>
    %308 = arith.subf %307, %300 : vector<8x128xf32>
    %309 = arith.mulf %308, %306 : vector<8x128xf32>
    %310 = arith.mulf %300, %257 : vector<8x128xf32>
    %311 = arith.addf %309, %310 : vector<8x128xf32>
    %c32_100 = arith.constant 32 : index
    %c0_101 = arith.constant 0 : index
    %312 = vector.load %arg13[%c32_100, %c0_101] : memref<64x128xf32, #tpu.memory_space<vmem>>, vector<8x128xf32>
    tpu.vector_store %arg13[%c32_100, %c0_101], %311 {strides = array<i32>} : memref<64x128xf32, #tpu.memory_space<vmem>>, vector<8x128xf32>,
    %c48 = arith.constant 48 : index
    %c0_102 = arith.constant 0 : index
    %313 = vector.load %arg14[%c48, %c0_102] : memref<64x384xf32, #tpu.memory_space<vmem>>, vector<8x384xf32>
    %c0_103 = arith.constant 0 : index
    %c0_104 = arith.constant 0 : index
    %314 = vector.load %arg3[%c0_103, %c0_104] : memref<32x384xf32, #tpu.memory_space<vmem>>, vector<32x384xf32>
    %315 = vector.extract_strided_slice %283 {offsets = [0, 0], sizes = [8, 32], strides = [1, 1]} : vector<8x128xf32> to vector<8x32xf32>
    %cst_105 = arith.constant dense<0.000000e+00> : vector<8x384xf32>
    %316 = tpu.matmul %315, %314, %cst_105 {dimension_numbers = #tpu.dot_dimension_numbers<[1], [0], [0], [1], [0, 0, 1, 1], [], []>} : vector<8x32xf32>, vector<32x384xf32>, vector<8x384xf32> -> vector<8x384xf32>
    %317 = vector.extract_strided_slice %313 {offsets = [0, 0], sizes = [8, 256], strides = [1, 1]} : vector<8x384xf32> to vector<8x256xf32>
    %318 = vector.extract_strided_slice %316 {offsets = [0, 0], sizes = [8, 256], strides = [1, 1]} : vector<8x384xf32> to vector<8x256xf32>
    %319 = arith.addf %317, %318 : vector<8x256xf32>
    %320 = arith.negf %319 : vector<8x256xf32>
    %321 = math.exp %320 : vector<8x256xf32>
    %cst_106 = arith.constant 1.000000e+00 : f32
    %322 = vector.broadcast %cst_106 : f32 to vector<8x256xf32>
    %323 = arith.addf %322, %321 : vector<8x256xf32>
    %324 = arith.divf %322, %323 : vector<8x256xf32>
    %325 = vector.extract_strided_slice %324 {offsets = [0, 0], sizes = [8, 128], strides = [1, 1]} : vector<8x256xf32> to vector<8x128xf32>
    %326 = vector.extract_strided_slice %324 {offsets = [0, 128], sizes = [8, 128], strides = [1, 1]} : vector<8x256xf32> to vector<8x128xf32>
    %327 = vector.extract_strided_slice %313 {offsets = [0, 256], sizes = [8, 128], strides = [1, 1]} : vector<8x384xf32> to vector<8x128xf32>
    %328 = vector.extract_strided_slice %316 {offsets = [0, 256], sizes = [8, 128], strides = [1, 1]} : vector<8x384xf32> to vector<8x128xf32>
    %329 = arith.addf %328, %9 : vector<8x128xf32>
    %330 = arith.mulf %325, %329 : vector<8x128xf32>
    %331 = arith.addf %327, %330 : vector<8x128xf32>
    %332 = math.tanh %331 : vector<8x128xf32>
    %cst_107 = arith.constant 1.000000e+00 : f32
    %333 = vector.broadcast %cst_107 : f32 to vector<8x128xf32>
    %334 = arith.subf %333, %326 : vector<8x128xf32>
    %335 = arith.mulf %334, %332 : vector<8x128xf32>
    %336 = arith.mulf %326, %283 : vector<8x128xf32>
    %337 = arith.addf %335, %336 : vector<8x128xf32>
    %338 = vector.extract_strided_slice %283 {offsets = [0, 0], sizes = [8, 32], strides = [1, 1]} : vector<8x128xf32> to vector<8x32xf32>
    %c0_108 = arith.constant 0 : index
    %c0_109 = arith.constant 0 : index
    %339 = vector.load %arg6[%c0_108, %c0_109] : memref<32x384xf32, #tpu.memory_space<vmem>>, vector<32x384xf32>
    %cst_110 = arith.constant dense<0.000000e+00> : vector<8x384xf32>
    %340 = tpu.matmul %338, %339, %cst_110 {dimension_numbers = #tpu.dot_dimension_numbers<[1], [0], [0], [1], [0, 0, 1, 1], [], []>} : vector<8x32xf32>, vector<32x384xf32>, vector<8x384xf32> -> vector<8x384xf32>
    %341 = arith.addf %340, %15 : vector<8x384xf32>
    %c0_111 = arith.constant 0 : index
    %c0_112 = arith.constant 0 : index
    %342 = vector.load %arg7[%c0_111, %c0_112] : memref<32x384xf32, #tpu.memory_space<vmem>>, vector<32x384xf32>
    %343 = vector.extract_strided_slice %311 {offsets = [0, 0], sizes = [8, 32], strides = [1, 1]} : vector<8x128xf32> to vector<8x32xf32>
    %cst_113 = arith.constant dense<0.000000e+00> : vector<8x384xf32>
    %344 = tpu.matmul %343, %342, %cst_113 {dimension_numbers = #tpu.dot_dimension_numbers<[1], [0], [0], [1], [0, 0, 1, 1], [], []>} : vector<8x32xf32>, vector<32x384xf32>, vector<8x384xf32> -> vector<8x384xf32>
    %345 = vector.extract_strided_slice %341 {offsets = [0, 0], sizes = [8, 256], strides = [1, 1]} : vector<8x384xf32> to vector<8x256xf32>
    %346 = vector.extract_strided_slice %344 {offsets = [0, 0], sizes = [8, 256], strides = [1, 1]} : vector<8x384xf32> to vector<8x256xf32>
    %347 = arith.addf %345, %346 : vector<8x256xf32>
    %348 = arith.negf %347 : vector<8x256xf32>
    %349 = math.exp %348 : vector<8x256xf32>
    %cst_114 = arith.constant 1.000000e+00 : f32
    %350 = vector.broadcast %cst_114 : f32 to vector<8x256xf32>
    %351 = arith.addf %350, %349 : vector<8x256xf32>
    %352 = arith.divf %350, %351 : vector<8x256xf32>
    %353 = vector.extract_strided_slice %352 {offsets = [0, 0], sizes = [8, 128], strides = [1, 1]} : vector<8x256xf32> to vector<8x128xf32>
    %354 = vector.extract_strided_slice %352 {offsets = [0, 128], sizes = [8, 128], strides = [1, 1]} : vector<8x256xf32> to vector<8x128xf32>
    %355 = vector.extract_strided_slice %341 {offsets = [0, 256], sizes = [8, 128], strides = [1, 1]} : vector<8x384xf32> to vector<8x128xf32>
    %356 = vector.extract_strided_slice %344 {offsets = [0, 256], sizes = [8, 128], strides = [1, 1]} : vector<8x384xf32> to vector<8x128xf32>
    %357 = arith.addf %356, %12 : vector<8x128xf32>
    %358 = arith.mulf %353, %357 : vector<8x128xf32>
    %359 = arith.addf %355, %358 : vector<8x128xf32>
    %360 = math.tanh %359 : vector<8x128xf32>
    %cst_115 = arith.constant 1.000000e+00 : f32
    %361 = vector.broadcast %cst_115 : f32 to vector<8x128xf32>
    %362 = arith.subf %361, %354 : vector<8x128xf32>
    %363 = arith.mulf %362, %360 : vector<8x128xf32>
    %364 = arith.mulf %354, %311 : vector<8x128xf32>
    %365 = arith.addf %363, %364 : vector<8x128xf32>
    %c40_116 = arith.constant 40 : index
    %c0_117 = arith.constant 0 : index
    %366 = vector.load %arg13[%c40_116, %c0_117] : memref<64x128xf32, #tpu.memory_space<vmem>>, vector<8x128xf32>
    tpu.vector_store %arg13[%c40_116, %c0_117], %365 {strides = array<i32>} : memref<64x128xf32, #tpu.memory_space<vmem>>, vector<8x128xf32>,
    %c56 = arith.constant 56 : index
    %c0_118 = arith.constant 0 : index
    %367 = vector.load %arg14[%c56, %c0_118] : memref<64x384xf32, #tpu.memory_space<vmem>>, vector<8x384xf32>
    %c0_119 = arith.constant 0 : index
    %c0_120 = arith.constant 0 : index
    %368 = vector.load %arg3[%c0_119, %c0_120] : memref<32x384xf32, #tpu.memory_space<vmem>>, vector<32x384xf32>
    %369 = vector.extract_strided_slice %337 {offsets = [0, 0], sizes = [8, 32], strides = [1, 1]} : vector<8x128xf32> to vector<8x32xf32>
    %cst_121 = arith.constant dense<0.000000e+00> : vector<8x384xf32>
    %370 = tpu.matmul %369, %368, %cst_121 {dimension_numbers = #tpu.dot_dimension_numbers<[1], [0], [0], [1], [0, 0, 1, 1], [], []>} : vector<8x32xf32>, vector<32x384xf32>, vector<8x384xf32> -> vector<8x384xf32>
    %371 = vector.extract_strided_slice %367 {offsets = [0, 0], sizes = [8, 256], strides = [1, 1]} : vector<8x384xf32> to vector<8x256xf32>
    %372 = vector.extract_strided_slice %370 {offsets = [0, 0], sizes = [8, 256], strides = [1, 1]} : vector<8x384xf32> to vector<8x256xf32>
    %373 = arith.addf %371, %372 : vector<8x256xf32>
    %374 = arith.negf %373 : vector<8x256xf32>
    %375 = math.exp %374 : vector<8x256xf32>
    %cst_122 = arith.constant 1.000000e+00 : f32
    %376 = vector.broadcast %cst_122 : f32 to vector<8x256xf32>
    %377 = arith.addf %376, %375 : vector<8x256xf32>
    %378 = arith.divf %376, %377 : vector<8x256xf32>
    %379 = vector.extract_strided_slice %378 {offsets = [0, 0], sizes = [8, 128], strides = [1, 1]} : vector<8x256xf32> to vector<8x128xf32>
    %380 = vector.extract_strided_slice %378 {offsets = [0, 128], sizes = [8, 128], strides = [1, 1]} : vector<8x256xf32> to vector<8x128xf32>
    %381 = vector.extract_strided_slice %367 {offsets = [0, 256], sizes = [8, 128], strides = [1, 1]} : vector<8x384xf32> to vector<8x128xf32>
    %382 = vector.extract_strided_slice %370 {offsets = [0, 256], sizes = [8, 128], strides = [1, 1]} : vector<8x384xf32> to vector<8x128xf32>
    %383 = arith.addf %382, %9 : vector<8x128xf32>
    %384 = arith.mulf %379, %383 : vector<8x128xf32>
    %385 = arith.addf %381, %384 : vector<8x128xf32>
    %386 = math.tanh %385 : vector<8x128xf32>
    %cst_123 = arith.constant 1.000000e+00 : f32
    %387 = vector.broadcast %cst_123 : f32 to vector<8x128xf32>
    %388 = arith.subf %387, %380 : vector<8x128xf32>
    %389 = arith.mulf %388, %386 : vector<8x128xf32>
    %390 = arith.mulf %380, %337 : vector<8x128xf32>
    %391 = arith.addf %389, %390 : vector<8x128xf32>
    %392 = vector.extract_strided_slice %337 {offsets = [0, 0], sizes = [8, 32], strides = [1, 1]} : vector<8x128xf32> to vector<8x32xf32>
    %c0_124 = arith.constant 0 : index
    %c0_125 = arith.constant 0 : index
    %393 = vector.load %arg6[%c0_124, %c0_125] : memref<32x384xf32, #tpu.memory_space<vmem>>, vector<32x384xf32>
    %cst_126 = arith.constant dense<0.000000e+00> : vector<8x384xf32>
    %394 = tpu.matmul %392, %393, %cst_126 {dimension_numbers = #tpu.dot_dimension_numbers<[1], [0], [0], [1], [0, 0, 1, 1], [], []>} : vector<8x32xf32>, vector<32x384xf32>, vector<8x384xf32> -> vector<8x384xf32>
    %395 = arith.addf %394, %15 : vector<8x384xf32>
    %c0_127 = arith.constant 0 : index
    %c0_128 = arith.constant 0 : index
    %396 = vector.load %arg7[%c0_127, %c0_128] : memref<32x384xf32, #tpu.memory_space<vmem>>, vector<32x384xf32>
    %397 = vector.extract_strided_slice %365 {offsets = [0, 0], sizes = [8, 32], strides = [1, 1]} : vector<8x128xf32> to vector<8x32xf32>
    %cst_129 = arith.constant dense<0.000000e+00> : vector<8x384xf32>
    %398 = tpu.matmul %397, %396, %cst_129 {dimension_numbers = #tpu.dot_dimension_numbers<[1], [0], [0], [1], [0, 0, 1, 1], [], []>} : vector<8x32xf32>, vector<32x384xf32>, vector<8x384xf32> -> vector<8x384xf32>
    %399 = vector.extract_strided_slice %395 {offsets = [0, 0], sizes = [8, 256], strides = [1, 1]} : vector<8x384xf32> to vector<8x256xf32>
    %400 = vector.extract_strided_slice %398 {offsets = [0, 0], sizes = [8, 256], strides = [1, 1]} : vector<8x384xf32> to vector<8x256xf32>
    %401 = arith.addf %399, %400 : vector<8x256xf32>
    %402 = arith.negf %401 : vector<8x256xf32>
    %403 = math.exp %402 : vector<8x256xf32>
    %cst_130 = arith.constant 1.000000e+00 : f32
    %404 = vector.broadcast %cst_130 : f32 to vector<8x256xf32>
    %405 = arith.addf %404, %403 : vector<8x256xf32>
    %406 = arith.divf %404, %405 : vector<8x256xf32>
    %407 = vector.extract_strided_slice %406 {offsets = [0, 0], sizes = [8, 128], strides = [1, 1]} : vector<8x256xf32> to vector<8x128xf32>
    %408 = vector.extract_strided_slice %406 {offsets = [0, 128], sizes = [8, 128], strides = [1, 1]} : vector<8x256xf32> to vector<8x128xf32>
    %409 = vector.extract_strided_slice %395 {offsets = [0, 256], sizes = [8, 128], strides = [1, 1]} : vector<8x384xf32> to vector<8x128xf32>
    %410 = vector.extract_strided_slice %398 {offsets = [0, 256], sizes = [8, 128], strides = [1, 1]} : vector<8x384xf32> to vector<8x128xf32>
    %411 = arith.addf %410, %12 : vector<8x128xf32>
    %412 = arith.mulf %407, %411 : vector<8x128xf32>
    %413 = arith.addf %409, %412 : vector<8x128xf32>
    %414 = math.tanh %413 : vector<8x128xf32>
    %cst_131 = arith.constant 1.000000e+00 : f32
    %415 = vector.broadcast %cst_131 : f32 to vector<8x128xf32>
    %416 = arith.subf %415, %408 : vector<8x128xf32>
    %417 = arith.mulf %416, %414 : vector<8x128xf32>
    %418 = arith.mulf %408, %365 : vector<8x128xf32>
    %419 = arith.addf %417, %418 : vector<8x128xf32>
    %c48_132 = arith.constant 48 : index
    %c0_133 = arith.constant 0 : index
    %420 = vector.load %arg13[%c48_132, %c0_133] : memref<64x128xf32, #tpu.memory_space<vmem>>, vector<8x128xf32>
    tpu.vector_store %arg13[%c48_132, %c0_133], %419 {strides = array<i32>} : memref<64x128xf32, #tpu.memory_space<vmem>>, vector<8x128xf32>,
    %421 = vector.extract_strided_slice %391 {offsets = [0, 0], sizes = [8, 32], strides = [1, 1]} : vector<8x128xf32> to vector<8x32xf32>
    %c0_134 = arith.constant 0 : index
    %c0_135 = arith.constant 0 : index
    %422 = vector.load %arg6[%c0_134, %c0_135] : memref<32x384xf32, #tpu.memory_space<vmem>>, vector<32x384xf32>
    %cst_136 = arith.constant dense<0.000000e+00> : vector<8x384xf32>
    %423 = tpu.matmul %421, %422, %cst_136 {dimension_numbers = #tpu.dot_dimension_numbers<[1], [0], [0], [1], [0, 0, 1, 1], [], []>} : vector<8x32xf32>, vector<32x384xf32>, vector<8x384xf32> -> vector<8x384xf32>
    %424 = arith.addf %423, %15 : vector<8x384xf32>
    %c0_137 = arith.constant 0 : index
    %c0_138 = arith.constant 0 : index
    %425 = vector.load %arg7[%c0_137, %c0_138] : memref<32x384xf32, #tpu.memory_space<vmem>>, vector<32x384xf32>
    %426 = vector.extract_strided_slice %419 {offsets = [0, 0], sizes = [8, 32], strides = [1, 1]} : vector<8x128xf32> to vector<8x32xf32>
    %cst_139 = arith.constant dense<0.000000e+00> : vector<8x384xf32>
    %427 = tpu.matmul %426, %425, %cst_139 {dimension_numbers = #tpu.dot_dimension_numbers<[1], [0], [0], [1], [0, 0, 1, 1], [], []>} : vector<8x32xf32>, vector<32x384xf32>, vector<8x384xf32> -> vector<8x384xf32>
    %428 = vector.extract_strided_slice %424 {offsets = [0, 0], sizes = [8, 256], strides = [1, 1]} : vector<8x384xf32> to vector<8x256xf32>
    %429 = vector.extract_strided_slice %427 {offsets = [0, 0], sizes = [8, 256], strides = [1, 1]} : vector<8x384xf32> to vector<8x256xf32>
    %430 = arith.addf %428, %429 : vector<8x256xf32>
    %431 = arith.negf %430 : vector<8x256xf32>
    %432 = math.exp %431 : vector<8x256xf32>
    %cst_140 = arith.constant 1.000000e+00 : f32
    %433 = vector.broadcast %cst_140 : f32 to vector<8x256xf32>
    %434 = arith.addf %433, %432 : vector<8x256xf32>
    %435 = arith.divf %433, %434 : vector<8x256xf32>
    %436 = vector.extract_strided_slice %435 {offsets = [0, 0], sizes = [8, 128], strides = [1, 1]} : vector<8x256xf32> to vector<8x128xf32>
    %437 = vector.extract_strided_slice %435 {offsets = [0, 128], sizes = [8, 128], strides = [1, 1]} : vector<8x256xf32> to vector<8x128xf32>
    %438 = vector.extract_strided_slice %424 {offsets = [0, 256], sizes = [8, 128], strides = [1, 1]} : vector<8x384xf32> to vector<8x128xf32>
    %439 = vector.extract_strided_slice %427 {offsets = [0, 256], sizes = [8, 128], strides = [1, 1]} : vector<8x384xf32> to vector<8x128xf32>
    %440 = arith.addf %439, %12 : vector<8x128xf32>
    %441 = arith.mulf %436, %440 : vector<8x128xf32>
    %442 = arith.addf %438, %441 : vector<8x128xf32>
    %443 = math.tanh %442 : vector<8x128xf32>
    %cst_141 = arith.constant 1.000000e+00 : f32
    %444 = vector.broadcast %cst_141 : f32 to vector<8x128xf32>
    %445 = arith.subf %444, %437 : vector<8x128xf32>
    %446 = arith.mulf %445, %443 : vector<8x128xf32>
    %447 = arith.mulf %437, %419 : vector<8x128xf32>
    %448 = arith.addf %446, %447 : vector<8x128xf32>
    %c56_142 = arith.constant 56 : index
    %c0_143 = arith.constant 0 : index
    %449 = vector.load %arg13[%c56_142, %c0_143] : memref<64x128xf32, #tpu.memory_space<vmem>>, vector<8x128xf32>
    tpu.vector_store %arg13[%c56_142, %c0_143], %448 {strides = array<i32>} : memref<64x128xf32, #tpu.memory_space<vmem>>, vector<8x128xf32>,
    %c0_144 = arith.constant 0 : index
    %c0_145 = arith.constant 0 : index
    %450 = vector.load %arg13[%c0_144, %c0_145] : memref<64x128xf32, #tpu.memory_space<vmem>>, vector<64x128xf32>
    %451 = vector.extract_strided_slice %450 {offsets = [0, 0], sizes = [64, 32], strides = [1, 1]} : vector<64x128xf32> to vector<64x32xf32>
    %c0_146 = arith.constant 0 : index
    %c0_147 = arith.constant 0 : index
    %452 = vector.load %arg10[%c0_146, %c0_147] : memref<32x128xf32, #tpu.memory_space<vmem>>, vector<32x128xf32>
    %cst_148 = arith.constant dense<0.000000e+00> : vector<64x128xf32>
    %453 = tpu.matmul %451, %452, %cst_148 {dimension_numbers = #tpu.dot_dimension_numbers<[1], [0], [0], [1], [0, 0, 1, 1], [], []>} : vector<64x32xf32>, vector<32x128xf32>, vector<64x128xf32> -> vector<64x128xf32>
    %c0_149 = arith.constant 0 : index
    %c0_150 = arith.constant 0 : index
    %454 = vector.load %arg11[%c0_149, %c0_150] : memref<1x128xf32, #tpu.memory_space<vmem>>, vector<1x128xf32>
    %455 = vector.broadcast %454 : vector<1x128xf32> to vector<64x128xf32>
    %456 = arith.addf %453, %455 : vector<64x128xf32>
    %c0_151 = arith.constant 0 : index
    %c0_152 = arith.constant 0 : index
    %457 = vector.load %arg12[%c0_151, %c0_152] : memref<64x128xf32, #tpu.memory_space<vmem>>, vector<64x128xf32>
    tpu.vector_store %arg12[%c0_151, %c0_152], %456 {strides = array<i32>} : memref<64x128xf32, #tpu.memory_space<vmem>>, vector<64x128xf32>,
    return
  }
  func.func @transform_0(%arg0: i32) -> (i32, i32) {
    %c0_i32 = arith.constant 0 : i32
    %c0_i32_0 = arith.constant 0 : i32
    %c0_i32_1 = arith.constant 0 : i32
    return %c0_i32, %c0_i32_0 : i32, i32
  }
  func.func @transform_1(%arg0: i32) -> (i32, i32) {
    %c0_i32 = arith.constant 0 : i32
    %c0_i32_0 = arith.constant 0 : i32
    %c0_i32_1 = arith.constant 0 : i32
    return %c0_i32, %c0_i32_0 : i32, i32
  }
  func.func @transform_2(%arg0: i32) -> (i32, i32) {
    %c0_i32 = arith.constant 0 : i32
    %c0_i32_0 = arith.constant 0 : i32
    %c0_i32_1 = arith.constant 0 : i32
    return %c0_i32, %c0_i32_0 : i32, i32
  }
  func.func @transform_3(%arg0: i32) -> (i32, i32) {
    %c0_i32 = arith.constant 0 : i32
    %c0_i32_0 = arith.constant 0 : i32
    %c0_i32_1 = arith.constant 0 : i32
    return %c0_i32, %c0_i32_0 : i32, i32
  }
  func.func @transform_4(%arg0: i32) -> (i32, i32) {
    %c0_i32 = arith.constant 0 : i32
    %c0_i32_0 = arith.constant 0 : i32
    %c0_i32_1 = arith.constant 0 : i32
    return %c0_i32, %c0_i32_0 : i32, i32
  }
  func.func @transform_5(%arg0: i32) -> (i32, i32) {
    %c0_i32 = arith.constant 0 : i32
    %c0_i32_0 = arith.constant 0 : i32
    %c0_i32_1 = arith.constant 0 : i32
    return %c0_i32, %c0_i32_0 : i32, i32
  }
  func.func @transform_6(%arg0: i32) -> (i32, i32) {
    %c0_i32 = arith.constant 0 : i32
    %c0_i32_0 = arith.constant 0 : i32
    %c0_i32_1 = arith.constant 0 : i32
    return %c0_i32, %c0_i32_0 : i32, i32
  }
  func.func @transform_7(%arg0: i32) -> (i32, i32) {
    %c0_i32 = arith.constant 0 : i32
    %c0_i32_0 = arith.constant 0 : i32
    %c0_i32_1 = arith.constant 0 : i32
    return %c0_i32, %c0_i32_0 : i32, i32
  }
  func.func @transform_8(%arg0: i32) -> (i32, i32) {
    %c0_i32 = arith.constant 0 : i32
    %c0_i32_0 = arith.constant 0 : i32
    %c0_i32_1 = arith.constant 0 : i32
    return %c0_i32, %c0_i32_0 : i32, i32
  }
  func.func @transform_9(%arg0: i32) -> (i32, i32) {
    %c0_i32 = arith.constant 0 : i32
    %c0_i32_0 = arith.constant 0 : i32
    %c0_i32_1 = arith.constant 0 : i32
    return %c0_i32, %c0_i32_0 : i32, i32
  }
  func.func @transform_10(%arg0: i32) -> (i32, i32) {
    %c0_i32 = arith.constant 0 : i32
    %c0_i32_0 = arith.constant 0 : i32
    %c0_i32_1 = arith.constant 0 : i32
    return %c0_i32, %c0_i32_0 : i32, i32
  }
  func.func @transform_11(%arg0: i32) -> (i32, i32) {
    %c0_i32 = arith.constant 0 : i32
    %c0_i32_0 = arith.constant 0 : i32
    %c0_i32_1 = arith.constant 0 : i32
    return %c0_i32, %c0_i32_0 : i32, i32
  }
}

</mosaic_0001>

<bundles_post_ra>
// kernel: tpu_custom_call.1
= control target key start
LH: loop header
LB: loop body
LE: loop exit
PB: predicated region body
PF: predicated region fallthrough
CT: control target
= control target key end

     0   :  { %16 = vsyncpa [#allocation5], 0  ;;  %s6889_s0 = inlined_call_operand.vmem [shape: f32[64,16], index: 0, kind: input, shape index: {}]   ;;  %s6890_s1 = inlined_call_operand.hbm [shape: f32[16,384], index: 1, kind: input, shape index: {}]   ;;  %s6891_s2 = inlined_call_operand.hbm [shape: f32[32,384], index: 2, kind: input, shape index: {}]   ;;  %s6892_s3 = inlined_call_operand.hbm [shape: f32[1,384], index: 3, kind: input, shape index: {}]   ;;  %s6893_s4 = inlined_call_operand.vmem [shape: f32[1,128], index: 4, kind: input, shape index: {}]   ;;  %s6894_s5 = inlined_call_operand.vmem [shape: f32[32,384], index: 5, kind: input, shape index: {}]   ;;  %s6895_s6 = inlined_call_operand.hbm [shape: f32[32,384], index: 6, kind: input, shape index: {}]   ;;  %s6896_s7 = inlined_call_operand.vmem [shape: f32[1,384], index: 7, kind: input, shape index: {}]   ;;  %s6897_s8 = inlined_call_operand.vmem [shape: f32[1,128], index: 8, kind: input, shape index: {}]   ;;  %s6898_s9 = inlined_call_operand.hbm [shape: f32[32,128], index: 9, kind: input, shape index: {}]   ;;  %s6899_s10 = inlined_call_operand.vmem [shape: f32[1,128], index: 10, kind: input, shape index: {}]   ;;  %s6900_s11 = inlined_call_operand.hbm [shape: f32[64,128], index: 11, kind: output, shape index: {}]  }
   0x1   :  { %17 = vsyncpa [#allocation8], 0 }
   0x2   :  { %18 = vsyncpa [#allocation11], 0 }
   0x3   :  { %19 = vsyncpa [#allocation6], 0  ;;  %s5980_s17 = smov [#allocation7]   ;;  %s5981_s19 = smov [#allocation10]  }
   0x4   :  { %s39_s18 = sshll.u32 %s5980_s17, 4  ;;  %s65_s20 = sshll.u32 %s5981_s19, 4  ;;  %s40_s18 = int_to_ptr.vmem [resolvable:$true] %s39_s18  ;;  %s6053_s20 = int_to_ptr.vmem [resolvable:$true] %s65_s20 }
   0x5   :  { %s5840_s23 = scalar_lea.hbm %s6891_s2, 1536 }
   0x6   :  { %p5841_p0 = scmp.ne.s32.totalorder %s6891_s2, %s5840_s23  ;;  %p5844_p1 = scmp.lt.u32.totalorder %s5840_s23, %s6891_s2 }
   0x8   :  { %p5846_p2 = pnand %p5844_p1, %p5841_p0 }
   0xa   :  { %5849 = shalt.err (!%p5846_p2)
}
   0xb   :  { %s5850_s28 = scalar_lea.vmem %s40_s18, 1536  ;;  %p5855_p4 = scmp.lt.s32.totalorder %s40_s18, %s40_s18 }
   0xc   :  { %p5851_p3 = scmp.ne.s32.totalorder %s40_s18, %s5850_s28  ;;  %p5856_p5 = scmp.lt.s32.totalorder %s5850_s28, %s5850_s28 }
   0xe   :  { %p5857_p6 = por %p5856_p5, %p5855_p4 }
  0x10   :  { %p5858_p7 = pnand %p5857_p6, %p5851_p3 }
  0x12   :  { %5861 = shalt.err (!%p5858_p7)
}
  0x13   :  { %s5982_s29 = smov 384   ;;  %s5983_s30 = smov 24  }
  0x14   :  { %45 = dma.hbm_to_vmem [thread:$0]  %s6891_s2, 1536, %s40_s18, [#allocation8], %s5982_s29, %s5982_s29, %s5983_s30  }
  0x15   :  { %s5862_s16 = scalar_lea.hbm %s6895_s6, 1536 }
  0x16   :  { %p5863_p8 = scmp.ne.s32.totalorder %s6895_s6, %s5862_s16  ;;  %p5866_p9 = scmp.lt.u32.totalorder %s5862_s16, %s6895_s6 }
  0x18   :  { %p5868_p10 = pnand %p5866_p9, %p5863_p8 }
  0x1a   :  { %5871 = shalt.err (!%p5868_p10)
}
  0x1b   :  { %s5872_s23 = scalar_lea.vmem %s6053_s20, 1536  ;;  %p5877_p12 = scmp.lt.s32.totalorder %s6053_s20, %s6053_s20 }
  0x1c   :  { %p5873_p11 = scmp.ne.s32.totalorder %s6053_s20, %s5872_s23  ;;  %p5878_p13 = scmp.lt.s32.totalorder %s5872_s23, %s5872_s23 }
  0x1e   :  { %p5879_p0 = por %p5878_p13, %p5877_p12 }
  0x20   :  { %p5880_p1 = pnand %p5879_p0, %p5873_p11 }
  0x22   :  { %5883 = shalt.err (!%p5880_p1)
}
  0x23   :  { %71 = dma.hbm_to_vmem [thread:$0]  %s6895_s6, 1536, %s6053_s20, [#allocation11], %s5982_s29, %s5982_s29, %s5983_s30  }
  0x24   :  { %s5984_s24 = smov [#allocation4]   ;;  %s5985_s26 = smov [#allocation9]  }
  0x25   :  { %s27_s25 = sshll.u32 %s5984_s24, 4  ;;  %s52_s27 = sshll.u32 %s5985_s26, 4  ;;  %s28_s25 = int_to_ptr.vmem [resolvable:$true] %s27_s25  ;;  %s53_s27 = int_to_ptr.vmem [resolvable:$true] %s52_s27 }
  0x26   :  { %s5884_s13 = scalar_lea.hbm %s6890_s1, 768 }
  0x27   :  { %p5885_p2 = scmp.ne.s32.totalorder %s6890_s1, %s5884_s13  ;;  %p5888_p3 = scmp.lt.u32.totalorder %s5884_s13, %s6890_s1 }
  0x29   :  { %p5890_p4 = pnand %p5888_p3, %p5885_p2 }
  0x2b   :  { %5893 = shalt.err (!%p5890_p4)
}
  0x2c   :  { %s5894_s6 = scalar_lea.vmem %s28_s25, 768  ;;  %p5899_p6 = scmp.lt.s32.totalorder %s28_s25, %s28_s25 }
  0x2d   :  { %p5895_p5 = scmp.ne.s32.totalorder %s28_s25, %s5894_s6  ;;  %p5900_p7 = scmp.lt.s32.totalorder %s5894_s6, %s5894_s6 }
  0x2f   :  { %p5901_p8 = por %p5900_p7, %p5899_p6 }
  0x31   :  { %p5902_p9 = pnand %p5901_p8, %p5895_p5 }
  0x33   :  { %5905 = shalt.err (!%p5902_p9)
}
  0x34   :  { %33 = dma.hbm_to_vmem [thread:$0]  %s6890_s1, 768, %s28_s25, [#allocation5], %s5982_s29, %s5982_s29, %s5983_s30  }
  0x35   :  { %s5906_s23 = scalar_lea.hbm %s6892_s3, 48 }
  0x36   :  { %p5907_p10 = scmp.ne.s32.totalorder %s6892_s3, %s5906_s23  ;;  %p5910_p11 = scmp.lt.u32.totalorder %s5906_s23, %s6892_s3 }
  0x38   :  { %p5912_p12 = pnand %p5910_p11, %p5907_p10 }
  0x3a   :  { %5915 = shalt.err (!%p5912_p12)
}
  0x3b   :  { %s5916_s28 = scalar_lea.vmem %s53_s27, 48  ;;  %s5920_s12 = scalar_lea.vmem %s53_s27, 64 }
  0x3c   :  { %p5917_p13 = scmp.ne.s32.totalorder %s53_s27, %s5916_s28  ;;  %p5921_p0 = scmp.lt.s32.totalorder %s53_s27, %s53_s27 }
  0x3d   :  { %p5922_p1 = scmp.lt.s32.totalorder %s5920_s12, %s5916_s28 }
  0x3f   :  { %p5923_p2 = por %p5922_p1, %p5921_p0 }
  0x41   :  { %p5924_p3 = pnand %p5923_p2, %p5917_p13 }
  0x43   :  { %5927 = shalt.err (!%p5924_p3)
}
  0x44   :  { %55 = dma.hbm_to_vmem [thread:$0]  %s6892_s3, 48, %s53_s27, [#allocation8]  }
  0x45   :  { %s5986_s30 = smov [#allocation12]   ;;  %s5928_s15 = scalar_lea.hbm %s6898_s9, 512 }
  0x46   :  { %s81_s25 = sshll.u32 %s5986_s30, 4  ;;  %p5929_p4 = scmp.ne.s32.totalorder %s6898_s9, %s5928_s15  ;;  %s82_s25 = int_to_ptr.vmem [resolvable:$true] %s81_s25 }
  0x47   :  { %p5932_p5 = scmp.lt.u32.totalorder %s5928_s15, %s6898_s9 }
  0x49   :  { %p5934_p6 = pnand %p5932_p5, %p5929_p4 }
  0x4b   :  { %5937 = shalt.err (!%p5934_p6)
}
  0x4c   :  { %s5938_s19 = scalar_lea.vmem %s82_s25, 512  ;;  %p5943_p8 = scmp.lt.s32.totalorder %s82_s25, %s82_s25 }
  0x4d   :  { %p5939_p7 = scmp.ne.s32.totalorder %s82_s25, %s5938_s19  ;;  %p5944_p9 = scmp.lt.s32.totalorder %s5938_s19, %s5938_s19 }
  0x4f   :  { %p5945_p10 = por %p5944_p9, %p5943_p8 }
  0x51   :  { %p5946_p11 = pnand %p5945_p10, %p5939_p7 }
  0x53   :  { %5949 = shalt.err (!%p5946_p11)
}
  0x54   :  { %s5987_s3 = smov 128   ;;  %s5988_s27 = smov 8  }
  0x55   :  { %87 = dma.hbm_to_vmem [thread:$0]  %s6898_s9, 512, %s82_s25, [#allocation11], %s5987_s3, %s5987_s3, %s5988_s27  }
  0x56   :  { %5972 = dma.done.wait [#allocation5], 768  }
  0x57   :  { %5973 = vsyncadd [#allocation5], 4294966528 }
  0x58   :  { %5974 = dma.done.wait [#allocation8], 1584  }
  0x59   :  { %5975 = vsyncadd [#allocation8], 4294965712 }
  0x5a   :  { %5976 = dma.done.wait [#allocation11], 2048  }
  0x5b   :  { %5977 = vsyncadd [#allocation11], 4294965248  ;;  %v5989_v0 = vmov 0.0   ;;  %v114_v1 = vld [vmem:[#allocation4 + $0x8] sm:$0xff]  ;;  %v117_v2 = vld [vmem:[#allocation4 + $0x20] sm:$0xff]  ;;  %vm136_vm0 = vcmask 130048   ;;  %v121_v40 = vlaneseq }
  0x5c   :  { %225 = vmatprep.mubr.f32.mxu0 %v5989_v0  ;;  %261 = vmatprep.mubr.f32.mxu1 %v5989_v0  ;;  %v113_v3 = vld [vmem:[#allocation4] sm:$0xff]  ;;  %v5247_v4 = vpack.c.bf16 %v117_v2, %v114_v1  ;;  %v116_v5 = vld [vmem:[#allocation4 + $0x18] sm:$0xff]  ;;  %v441_v8 = vld [vmem:[#allocation7 + $0x20] sm:$0xff]  ;;  %v5990_v30 = vmov 0.0|0.0   ;;  %vm5991_vm1 = vmmov 0   ;;  %vm449_vm2 = vcmask 261120  }
  0x5d   :  { %v438_v6 = vld [vmem:[#allocation7 + $0x8] sm:$0xff]  ;;  %v5249_v7 = vpack.c.bf16 %v116_v5, %v113_v3  ;;  %v437_v9 = vld [vmem:[#allocation7] sm:$0xff]  ;;  %v440_v10 = vld [vmem:[#allocation7 + $0x18] sm:$0xff]  ;;  %v6226_v41 = vshrl.u32 %v121_v40, 7 }
  0x5e   :  { %5248 = vmatprep.subr.bf16.mxu0 %v5247_v4  ;;  %v6134_v11 = vpack.c.bf16 %v441_v8, %v438_v6  ;;  %5599 = vmatprep.subr.bf16.mxu1 %v5247_v4  ;;  %v105_v12 = vld [vmem:[%s6889_s0] sm:$0xff]  ;;  %v6139_v13 = vpack.c.bf16 %v440_v10, %v437_v9  ;;  %v444_v14 = vld [vmem:[#allocation7 + $0x38] sm:$0xff]  ;;  %v446_v18 = vld [vmem:[#allocation7 + $0x48] sm:$0xff] }
  0x5f   :  { %5250 = vmatpush1.bf16.msra.mxu0 %v5249_v7  ;;  %v447_v15 = vld [vmem:[#allocation7 + $0x50] sm:$0xff]  ;;  %5600 = vmatpush1.bf16.msra.mxu1 %v5249_v7  ;;  %v111_v19 = vld [vmem:[%s6889_s0 + $0x30] sm:$0xff]  ;;  %v118_v21 = vld [vmem:[#allocation4 + $0x28] sm:$0xff]  ;;  %v131_v44 = vsub.s32 2, %v6226_v41  ;;  %v123_v57 = vsub.s32 0, %v6226_v41  ;;  %v127_v61 = vsub.s32 1, %v6226_v41 }
  0x60   :  { %5256 = vmatprep.subr.bf16.mxu0 %v6134_v11  ;;  %v6142_v16 = vpack.c.bf16 %v447_v15, %v444_v14  ;;  %v443_v17 = vld [vmem:[#allocation7 + $0x30] sm:$0xff]  ;;  %v115_v20 = vld [vmem:[#allocation4 + $0x10] sm:$0xff]  ;;  %v106_v23 = vld [vmem:[%s6889_s0 + $0x8] sm:$0xff] }
  0x61   :  { %v5251_v22 = vpack.c.bf16 %v118_v21, %v115_v20  ;;  %v6154_v24 = vpack.c.bf16 %v446_v18, %v443_v17  ;;  %v112_v25 = vld [vmem:[%s6889_s0 + $0x38] sm:$0xff]  ;;  %v439_v26 = vld [vmem:[#allocation7 + $0x10] sm:$0xff]  ;;  %v107_v28 = vld [vmem:[%s6889_s0 + $0x10] sm:$0xff] }
  0x62   :  { %4702 = vmatmul.mubr.msk.f32.vlgmr.msra.gmra.mrb[0].mxu0 %vm136_vm0, %v105_v12  ;;  %4708 = vmatmul.mubr.msk.f32.vlgmr.msra.gmra.mrb[0].mxu1 %vm136_vm0, %v111_v19  ;;  %v442_v27 = vld [vmem:[#allocation7 + $0x28] sm:$0xff]  ;;  %v445_v31 = vld [vmem:[#allocation7 + $0x40] sm:$0xff]  ;;  %v448_v32 = vld [vmem:[#allocation7 + $0x58] sm:$0xff] }
  0x63   :  { %5258 = vmatpush1.bf16.msra.mxu0 %v6139_v13  ;;  %231 = vmatprep.mubr.f32.mxu0 %v5989_v0  ;;  %v6168_v29 = vpack.c.bf16 %v442_v27, %v439_v26  ;;  %v108_v33 = vld [vmem:[%s6889_s0 + $0x18] sm:$0xff]  ;;  %v6182_v34 = vpack.c.bf16 %v448_v32, %v445_v31  ;;  %v109_v35 = vld [vmem:[%s6889_s0 + $0x20] sm:$0xff]  ;;  %v110_v36 = vld [vmem:[%s6889_s0 + $0x28] sm:$0xff] }
  0x64   :  { %5260 = vmatprep.subr.bf16.mxu0 %v6142_v16  ;;  %5252 = vmatprep.subr.bf16.mxu1 %v5251_v22  ;;  %v786_v37 = vld [vmem:[%s6894_s5 + $0x8] sm:$0xff]  ;;  %v789_v38 = vld [vmem:[%s6894_s5 + $0x20] sm:$0xff]  ;;  %v119_v45 = vld [vmem:[#allocation9] sm:$0x7] }
  0x65   :  { %5254 = vmatpush3.bf16.msra.mxu1 %v5251_v22  ;;  %267 = vmatprep.mubr.f32.mxu1 %v5989_v0  ;;  %v6223_v39 = vpack.c.bf16 %v789_v38, %v786_v37  ;;  %v132_v48 = vrot.slane %v119_v45, %v131_v44  ;;  %v6253_v63 = vrot.slane %v119_v45, %v123_v57  ;;  %v785_v31 = vld [vmem:[%s6894_s5] sm:$0xff]  ;;  %v788_v32 = vld [vmem:[%s6894_s5 + $0x18] sm:$0xff] }
  0x66   :  { %4703 = vmatmul.mubr.msk.f32.gmra.mrb[2].mxu0 %vm136_vm0, %v106_v23  ;;  %4709 = vmatmul.mubr.msk.f32.gmra.mrb[2].mxu1 %vm136_vm0, %v112_v25  ;;  %v6261_v5 = vrot.slane %v119_v45, %v127_v61  ;;  %v940_v37 = vld [vmem:[#allocation10 + $0x10] sm:$0xff]  ;;  %v943_v38 = vld [vmem:[#allocation10 + $0x28] sm:$0xff] }
  0x67   :  { %237 = vmatprep.mubr.f32.mxu0 %v5989_v0  ;;  %5262 = vmatpush1.bf16.msra.mxu0 %v6154_v24 }
  0x68   :  { %4951 = vmatprep.mubr.msk.f32.mxu1 %vm136_vm0, %v105_v12  ;;  %5263 = vmatprep.subr.bf16.mxu1 %v5990_v30 }
  0x69   :  { %5270 = vmatprep.subr.bf16.mxu0 %v6134_v11 }
  0x6a   :  { %4704 = vmatmul.mubr.msk.f32.gmra.mrb[4].mxu0 %vm136_vm0, %v107_v28  ;;  %4952 = vmatmul.mubr.msk.f32.vlgmr.msra.gmra.mrb[4].mxu1 %vm136_vm0, %v106_v23 }
  0x6b   :  { %243 = vmatprep.mubr.f32.mxu0 %v5989_v0  ;;  %5265 = vmatpush3.bf16.msra.mxu1 %v6168_v29 }
  0x6c   :  { %4954 = vmatprep.mubr.msk.f32.mxu1 %vm136_vm0, %v107_v28  ;;  %5266 = vmatprep.subr.bf16.mxu1 %v5990_v30 }
  0x6e   :  { %4705 = vmatmul.mubr.msk.f32.gmra.mrb[6].mxu0 %vm136_vm0, %v108_v33  ;;  %4955 = vmatmul.mubr.msk.f32.gmra.mrb[6].mxu1 %vm136_vm0, %v108_v33  ;;  %v792_v33 = vld [vmem:[%s6894_s5 + $0x38] sm:$0xff] }
  0x6f   :  { %249 = vmatprep.mubr.f32.mxu0 %v5989_v0  ;;  %4957 = vmatprep.mubr.msk.f32.mxu1 %vm136_vm0, %v109_v35 }
  0x70   :  { %5268 = vmatpush3.bf16.msra.mxu1 %v6182_v34 }
  0x71   :  { %5277 = vmatprep.subr.bf16.mxu1 %v5990_v30 }
  0x72   :  { %4706 = vmatmul.mubr.msk.f32.gmra.mrb[8].mxu0 %vm136_vm0, %v109_v35  ;;  %4958 = vmatmul.mubr.msk.f32.gmra.mrb[8].mxu1 %vm136_vm0, %v110_v36 }
  0x73   :  { %255 = vmatprep.mubr.f32.mxu0 %v5989_v0  ;;  %4960 = vmatprep.mubr.msk.f32.mxu1 %vm136_vm0, %v111_v19  ;;  %v6268_v19 = vld [vmem:[%s6893_s4] ss:$0 sm:$0xff] }
  0x76   :  { %4707 = vmatmul.mubr.msk.f32.gmra.mrb[10].mxu0 %vm136_vm0, %v110_v36  ;;  %4961 = vmatmul.mubr.msk.f32.gmra.mrb[10].mxu1 %vm136_vm0, %v112_v25  ;;  %v795_v36 = vld [vmem:[%s6894_s5 + $0x50] sm:$0xff] }
  0x77   :  { %517 = vmatprep.mubr.f32.mxu0 %v5989_v0  ;;  %4971 = vmatprep.mubr.msk.f32.mxu1 %vm5991_vm1, %v5989_v0 }
  0x7a   :  { %518 = vmatmul.mubr.f32.vlgmr.msra.gmra.mrb[0].mxu0 %v5989_v0  ;;  %4972 = vmatmul.mubr.f32.vlgmr.msra.gmra.mrb[12].mxu1 %v5989_v0 }
  0x7b   :  { %5279 = vmatpush3.bf16.msra.mxu1 %v6168_v29  ;;  %5272 = vmatpush1.bf16.msra.mxu0 %v6139_v13 }
  0x7c   :  { %5280 = vmatprep.subr.bf16.mxu1 %v5990_v30  ;;  %5274 = vmatprep.subr.bf16.mxu0 %v6142_v16 }
  0x7d   :  { %686 = vmatprep.mubr.f32.mxu0 %v5989_v0  ;;  %4982 = vmatprep.mubr.msk.f32.mxu1 %vm5991_vm1, %v5989_v0 }
  0x7f   :  { %5282 = vmatpush3.bf16.msra.mxu1 %v6182_v34  ;;  %5276 = vmatpush1.bf16.msra.mxu0 %v6154_v24 }
  0x80   :  { %5305 = vmatprep.subr.bf16.mxu0 %v5990_v30  ;;  %5284 = vmatprep.subr.bf16.mxu1 %v6223_v39 }
 0x135   :  { %v6228_v42 = vpop.f32.mrb[0].mxu1 }
 0x136   :  { %v6230_v43 = vpop.f32.mrb[1].mxu1 }
 0x139   :  { %v6233_v46 = vpop.f32.mrb[2].mxu1 }
 0x13a   :  { %v6235_v47 = vpop.f32.mrb[3].mxu1 }
 0x13d   :  { %v4953_v49 = vpop.f32.mrb[4].mxu1 }
 0x13e   :  { %v6239_v50 = vadd.f32 %v4953_v49, %v132_v48  ;;  %v340_v51 = vpop.f32.mrb[5].mxu1 }
 0x13f   :  { %v341_v23 = vadd.f32 %v340_v51, %v132_v48  ;;  %v6287_v51 = vpack.c.bf16 %v795_v36, %v792_v33 }
 0x141   :  { %v4956_v52 = vpop.f32.mrb[6].mxu1 }
 0x142   :  { %v6241_v53 = vadd.f32 %v4956_v52, %v132_v48  ;;  %v350_v54 = vpop.f32.mrb[7].mxu1  ;;  %v791_v52 = vld [vmem:[%s6894_s5 + $0x30] sm:$0xff] }
 0x143   :  { %v6243_v55 = vadd.f32 %v350_v54, %v132_v48  ;;  %v794_v54 = vld [vmem:[%s6894_s5 + $0x48] sm:$0xff] }
 0x145   :  { %v4959_v56 = vpop.f32.mrb[8].mxu1 }
 0x146   :  { %v6246_v58 = vadd.f32 %v4959_v56, %v132_v48  ;;  %v360_v59 = vpop.f32.mrb[9].mxu1  ;;  %v6295_v56 = vpack.c.bf16 %v943_v38, %v940_v37 }
 0x147   :  { %v6248_v60 = vadd.f32 %v360_v59, %v132_v48  ;;  %v946_v59 = vld [vmem:[#allocation10 + $0x40] sm:$0xff] }
 0x149   :  { %v4962_v62 = vpop.f32.mrb[10].mxu1 }
 0x14a   :  { %v6255_v1 = vadd.f32 %v4962_v62, %v132_v48  ;;  %v370_v2 = vpop.f32.mrb[11].mxu1  ;;  %v949_v62 = vld [vmem:[#allocation10 + $0x58] sm:$0xff] }
 0x14b   :  { %v6257_v3 = vadd.f32 %v370_v2, %v132_v48  ;;  %v6283_v48 = vpack.c.bf16 %v788_v32, %v785_v31  ;;  %v6302_v2 = vpack.c.bf16 %v794_v54, %v791_v52 }
 0x14d   :  { %v519_v4 = vpop.f32.mrb[0].mxu0  ;;  %v590_v6 = vpop.f32.mrb[12].mxu1 }
 0x14e   :  { %v5601_v7 = vadd.f32 %v519_v4, %v6253_v63  ;;  %v521_v8 = vpop.f32.mrb[1].mxu0  ;;  %v4973_v9 = vpop.f32.mrb[13].mxu1  ;;  %v608_v21 = vadd.f32 %v6268_v19, %v590_v6  ;;  %v787_v4 = vld [vmem:[%s6894_s5 + $0x10] sm:$0xff]  ;;  %v790_v6 = vld [vmem:[%s6894_s5 + $0x28] sm:$0xff] }
 0x14f   :  { %v5602_v12 = vadd.f32 %v521_v8, %v6261_v5  ;;  %v6319_v8 = vpack.c.bf16 %v790_v6, %v787_v4  ;;  %v793_v9 = vld [vmem:[%s6894_s5 + $0x40] sm:$0xff] }
 0x150   :  { %v4720_v10 = vmul.f32 -1.442695, %v5601_v7  ;;  %v6313_v7 = vpack.c.bf16 %v949_v62, %v946_v59  ;;  %v417_v6 = vld [vmem:[%s6896_s7] sm:$0x7] }
 0x151   :  { %v4721_v14 = vmul.f32 -1.442695, %v5602_v12  ;;  %v939_v12 = vld [vmem:[#allocation10 + $0x8] sm:$0xff] }
 0x152   :  { %5678 = vpow2.f32 %v4720_v10  ;;  %v796_v10 = vld [vmem:[%s6894_s5 + $0x58] sm:$0xff] }
 0x153   :  { %5680 = vpow2.f32 %v4721_v14  ;;  %v942_v14 = vld [vmem:[#allocation10 + $0x20] sm:$0xff] }
 0x15c   :  { %v5679_v15 = vpop.eup %5678 }
 0x15d   :  { %v602_v17 = vadd.f32 1.0, %v5679_v15  ;;  %v5681_v18 = vpop.eup %5680  ;;  %v6333_v15 = vpack.c.bf16 %v796_v10, %v793_v9  ;;  %v6375_v10 = vrot.slane %v417_v6, %v123_v57 }
 0x15e   :  { %v603_v20 = vadd.f32 1.0, %v5681_v18  ;;  %v938_v18 = vld [vmem:[#allocation10] sm:$0xff] }
 0x15f   :  { %5682 = vrcp.f32 %v602_v17  ;;  %v6338_v17 = vpack.c.bf16 %v942_v14, %v939_v12 }
 0x160   :  { %5684 = vrcp.f32 %v603_v20  ;;  %v941_v20 = vld [vmem:[#allocation10 + $0x18] sm:$0xff] }
 0x169   :  { %v5683_v22 = vpop.eup %5682 }
 0x16a   :  { %v609_v25 = vmul.f32 %v5683_v22, %v608_v21  ;;  %v5685_v27 = vpop.eup %5684  ;;  %v945_v21 = vld [vmem:[#allocation10 + $0x38] sm:$0xff]  ;;  %v948_v22 = vld [vmem:[#allocation10 + $0x50] sm:$0xff] }
 0x16b   :  { %v612_v28 = vsub.f32 1.0, %v5685_v27  ;;  %v614_v45 = vmul.f32 0.0, %v5685_v27  ;;  %v947_v27 = vld [vmem:[#allocation10 + $0x48] sm:$0xff] }
 0x16c   :  { %v610_v26 = vadd.f32 %v609_v25, %v341_v23  ;;  %v6345_v23 = vpack.c.bf16 %v941_v20, %v938_v18  ;;  %v6348_v25 = vpack.c.bf16 %v948_v22, %v945_v21  ;;  %v6379_v18 = vrot.slane %v417_v6, %v127_v61 }
 0x16e   :  { %5686 = vtanh.f32 %v610_v26  ;;  %v944_v26 = vld [vmem:[#allocation10 + $0x30] sm:$0xff] }
 0x178   :  { %v5687_v35 = vpop.eup %5686 }
 0x179   :  { %v613_v40 = vmul.f32 %v5687_v35, %v612_v28  ;;  %v6355_v28 = vpack.c.bf16 %v947_v27, %v944_v26 }
 0x17b   :  { %v6285_v49 = vadd.f32 %v614_v45, %v613_v40 }
 0x17d   :  { %4722 = vmatmul.mubr.msk.f32.vlgmr.msra.gmra.mrb[2].mxu0 %vm449_vm2, %v6285_v49  ;;  %4983 = vmatmul.mubr.msk.f32.vlgmr.msra.gmra.mrb[14].mxu1 %vm449_vm2, %v6285_v49 }
 0x17e   :  { %5286 = vmatpush1.bf16.msra.mxu1 %v6283_v48  ;;  %861 = vmatprep.mubr.f32.mxu1 %v5989_v0 }
 0x17f   :  { %5288 = vmatprep.subr.bf16.mxu1 %v6287_v51  ;;  %5307 = vmatpush3.bf16.msra.mxu0 %v6295_v56 }
 0x180   :  { %5308 = vmatprep.subr.bf16.mxu0 %v5990_v30  ;;  %5004 = vmatprep.mubr.msk.f32.mxu0 %vm5991_vm1, %v5989_v0 }
 0x182   :  { %5290 = vmatpush1.bf16.msra.mxu1 %v6302_v2 }
 0x183   :  { %5291 = vmatprep.subr.bf16.mxu1 %v5990_v30  ;;  %5310 = vmatpush3.bf16.msra.mxu0 %v6313_v7 }
 0x184   :  { %5312 = vmatprep.subr.bf16.mxu0 %v6134_v11 }
 0x185   :  { %4726 = vmatmul.mubr.msk.f32.vlgmr.msra.gmra.mrb[16].mxu1 %vm449_vm2, %v6285_v49 }
 0x186   :  { %5293 = vmatpush3.bf16.msra.mxu1 %v6319_v8  ;;  %4993 = vmatprep.mubr.msk.f32.mxu1 %vm5991_vm1, %v5989_v0 }
 0x187   :  { %5294 = vmatprep.subr.bf16.mxu1 %v5990_v30  ;;  %5005 = vmatmul.mubr.f32.vlgmr.msra.gmra.mrb[12].mxu0 %v5989_v0 }
 0x188   :  { %5314 = vmatpush1.bf16.msra.mxu0 %v6139_v13  ;;  %1196 = vmatprep.mubr.f32.mxu0 %v5989_v0 }
 0x189   :  { %5316 = vmatprep.subr.bf16.mxu0 %v6142_v16 }
 0x18a   :  { %5296 = vmatpush3.bf16.msra.mxu1 %v6333_v15 }
 0x18b   :  { %5298 = vmatprep.subr.bf16.mxu1 %v6338_v17 }
 0x18c   :  { %5318 = vmatpush1.bf16.msra.mxu0 %v6154_v24 }
 0x18d   :  { %4994 = vmatmul.mubr.msk.f32.vlgmr.msra.gmra.mrb[18].mxu1 %vm449_vm2, %v6285_v49  ;;  %5326 = vmatprep.subr.bf16.mxu0 %v6223_v39 }
 0x18e   :  { %5300 = vmatpush1.bf16.msra.mxu1 %v6345_v23  ;;  %1014 = vmatprep.mubr.f32.mxu1 %v5989_v0 }
 0x18f   :  { %5302 = vmatprep.subr.bf16.mxu1 %v6348_v25 }
 0x192   :  { %5304 = vmatpush1.bf16.msra.mxu1 %v6355_v28 }
 0x193   :  { %5319 = vmatprep.subr.bf16.mxu1 %v5990_v30 }
 0x195   :  { %1015 = vmatmul.mubr.f32.vlgmr.msra.gmra.mrb[16].mxu1 %v5989_v0 }
 0x196   :  { %5321 = vmatpush3.bf16.msra.mxu1 %v6168_v29  ;;  %5015 = vmatprep.mubr.msk.f32.mxu1 %vm5991_vm1, %v5989_v0 }
 0x197   :  { %5322 = vmatprep.subr.bf16.mxu1 %v5990_v30 }
 0x19a   :  { %5324 = vmatpush3.bf16.msra.mxu1 %v6182_v34 }
 0x19b   :  { %5333 = vmatprep.subr.bf16.mxu1 %v5990_v30 }
 0x250   :  { %v688_v31 = vpop.f32.mrb[2].mxu0  ;;  %v759_v32 = vpop.f32.mrb[14].mxu1 }
 0x251   :  { %v5603_v33 = vadd.f32 %v688_v31, %v6253_v63  ;;  %v690_v35 = vpop.f32.mrb[3].mxu0  ;;  %v4984_v36 = vpop.f32.mrb[15].mxu1  ;;  %v777_v22 = vadd.f32 %v6268_v19, %v759_v32 }
 0x252   :  { %v5604_v38 = vadd.f32 %v690_v35, %v6261_v5 }
 0x253   :  { %v4724_v37 = vmul.f32 -1.442695, %v5603_v33 }
 0x254   :  { %v4725_v40 = vmul.f32 -1.442695, %v5604_v38 }
 0x255   :  { %5688 = vpow2.f32 %v4724_v37 }
 0x256   :  { %5690 = vpow2.f32 %v4725_v40 }
 0x25a   :  { %v1087_v45 = vpop.f32.mrb[12].mxu0 }
 0x25b   :  { %v5006_v52 = vpop.f32.mrb[13].mxu0 }
 0x25f   :  { %v5689_v54 = vpop.eup %5688 }
 0x260   :  { %v771_v59 = vadd.f32 1.0, %v5689_v54  ;;  %v934_v62 = vpop.f32.mrb[18].mxu1  ;;  %v5691_v9 = vpop.eup %5690 }
 0x261   :  { %v4995_v4 = vpop.f32.mrb[19].mxu1  ;;  %v772_v12 = vadd.f32 1.0, %v5691_v9 }
 0x262   :  { %5692 = vrcp.f32 %v771_v59  ;;  %v6391_v4 = vld [vmem:[%s6897_s8] ss:$0 sm:$0xff] }
 0x263   :  { %5694 = vrcp.f32 %v772_v12 }
 0x268   :  { %v1016_v14 = vpop.f32.mrb[16].mxu1 }
 0x269   :  { %v5621_v20 = vadd.f32 %v1016_v14, %v6375_v10  ;;  %v1018_v21 = vpop.f32.mrb[17].mxu1 }
 0x26a   :  { %v5622_v31 = vadd.f32 %v1018_v21, %v6379_v18 }
 0x26b   :  { %v4728_v26 = vmul.f32 -1.442695, %v5621_v20 }
 0x26c   :  { %v5693_v27 = vpop.eup %5692  ;;  %v4729_v35 = vmul.f32 -1.442695, %v5622_v31 }
 0x26d   :  { %v778_v33 = vmul.f32 %v5693_v27, %v777_v22  ;;  %5696 = vpow2.f32 %v4728_v26  ;;  %v5695_v36 = vpop.eup %5694 }
 0x26e   :  { %v781_v38 = vsub.f32 1.0, %v5695_v36  ;;  %v783_v32 = vmul.f32 %v5695_v36, %v6285_v49  ;;  %v1105_v49 = vadd.f32 %v6391_v4, %v1087_v45 }
 0x26f   :  { %v779_v57 = vadd.f32 %v778_v33, %v6239_v50  ;;  %v6399_v50 = vrot.slane %v417_v6, %v131_v44 }
 0x271   :  { %5698 = vtanh.f32 %v779_v57  ;;  %v935_v41 = vadd.f32 %v934_v62, %v6399_v50 }
 0x272   :  { %5700 = vpow2.f32 %v4729_v35 }
 0x277   :  { %v5697_v61 = vpop.eup %5696 }
 0x278   :  { %v1099_v37 = vadd.f32 1.0, %v5697_v61 }
 0x27a   :  { %5702 = vrcp.f32 %v1099_v37 }
 0x27b   :  { %v5699_v40 = vpop.eup %5698 }
 0x27c   :  { %v782_v52 = vmul.f32 %v5699_v40, %v781_v38  ;;  %v5701_v54 = vpop.eup %5700 }
 0x27d   :  { %v1100_v9 = vadd.f32 1.0, %v5701_v54 }
 0x27e   :  { %v6386_v59 = vadd.f32 %v783_v32, %v782_v52 }
 0x27f   :  { %5704 = vrcp.f32 %v1100_v9 }
 0x280   :  { %4730 = vmatmul.mubr.msk.f32.vlgmr.msra.gmra.mrb[4].mxu0 %vm449_vm2, %v6386_v59  ;;  %5016 = vmatmul.mubr.msk.f32.vlgmr.msra.gmra.mrb[20].mxu1 %vm449_vm2, %v6386_v59 }
 0x281   :  { %5328 = vmatpush1.bf16.msra.mxu0 %v6283_v48  ;;  %5335 = vmatpush3.bf16.msra.mxu1 %v6319_v8 }
 0x282   :  { %5330 = vmatprep.subr.bf16.mxu0 %v6287_v51  ;;  %5336 = vmatprep.subr.bf16.mxu1 %v5990_v30 }
 0x283   :  { %1371 = vmatprep.mubr.f32.mxu0 %v5989_v0  ;;  %5026 = vmatprep.mubr.msk.f32.mxu1 %vm5991_vm1, %v5989_v0 }
 0x284   :  { %v5703_v12 = vpop.eup %5702 }
 0x285   :  { %v1106_v44 = vmul.f32 %v5703_v12, %v1105_v49  ;;  %5332 = vmatpush1.bf16.msra.mxu0 %v6302_v2  ;;  %5338 = vmatpush3.bf16.msra.mxu1 %v6333_v15 }
 0x286   :  { %5340 = vmatprep.subr.bf16.mxu0 %v6338_v17  ;;  %5347 = vmatprep.subr.bf16.mxu1 %v5990_v30 }
 0x287   :  { %v1107_v45 = vadd.f32 %v1106_v44, %v935_v41 }
 0x288   :  { %4734 = vmatmul.mubr.msk.f32.vlgmr.msra.gmra.mrb[14].mxu0 %vm449_vm2, %v6386_v59  ;;  %5027 = vmatmul.mubr.msk.f32.vlgmr.msra.gmra.mrb[22].mxu1 %vm449_vm2, %v6386_v59 }
 0x289   :  { %5706 = vtanh.f32 %v1107_v45  ;;  %5342 = vmatpush1.bf16.msra.mxu0 %v6345_v23  ;;  %5349 = vmatpush3.bf16.msra.mxu1 %v6295_v56  ;;  %v5705_v62 = vpop.eup %5704 }
 0x28a   :  { %5344 = vmatprep.subr.bf16.mxu0 %v6348_v25  ;;  %5350 = vmatprep.subr.bf16.mxu1 %v5990_v30  ;;  %v1109_v6 = vsub.f32 1.0, %v5705_v62  ;;  %v1111_v21 = vmul.f32 0.0, %v5705_v62 }
 0x28b   :  { %1527 = vmatprep.mubr.f32.mxu0 %v5989_v0  ;;  %5037 = vmatprep.mubr.msk.f32.mxu1 %vm5991_vm1, %v5989_v0 }
 0x28d   :  { %5346 = vmatpush1.bf16.msra.mxu0 %v6355_v28  ;;  %5352 = vmatpush3.bf16.msra.mxu1 %v6313_v7 }
 0x28e   :  { %5354 = vmatprep.subr.bf16.mxu0 %v6134_v11  ;;  %5361 = vmatprep.subr.bf16.mxu1 %v5990_v30 }
 0x293   :  { %v5707_v14 = vpop.eup %5706 }
 0x294   :  { %v1110_v20 = vmul.f32 %v5707_v14, %v1109_v6 }
 0x296   :  { %v6429_v22 = vadd.f32 %v1111_v21, %v1110_v20 }
 0x298   :  { %4736 = vmatmul.mubr.msk.f32.vlgmr.msra.gmra.mrb[14].mxu0 %vm449_vm2, %v6429_v22  ;;  %5038 = vmatmul.mubr.msk.f32.vlgmr.msra.gmra.mrb[24].mxu1 %vm449_vm2, %v6429_v22 }
 0x299   :  { %5356 = vmatpush1.bf16.msra.mxu0 %v6139_v13  ;;  %5363 = vmatpush3.bf16.msra.mxu1 %v6168_v29 }
 0x29a   :  { %5358 = vmatprep.subr.bf16.mxu0 %v6142_v16  ;;  %5364 = vmatprep.subr.bf16.mxu1 %v5990_v30 }
 0x29b   :  { %1709 = vmatprep.mubr.f32.mxu0 %v5989_v0  ;;  %5048 = vmatprep.mubr.msk.f32.mxu1 %vm5991_vm1, %v5989_v0 }
 0x29d   :  { %5360 = vmatpush1.bf16.msra.mxu0 %v6154_v24  ;;  %5366 = vmatpush3.bf16.msra.mxu1 %v6182_v34 }
 0x29e   :  { %5368 = vmatprep.subr.bf16.mxu0 %v6223_v39  ;;  %5375 = vmatprep.subr.bf16.mxu1 %v5990_v30 }
 0x353   :  { %v1198_v11 = vpop.f32.mrb[4].mxu0  ;;  %v1269_v13 = vpop.f32.mrb[20].mxu1 }
 0x354   :  { %v5605_v26 = vadd.f32 %v1198_v11, %v6253_v63  ;;  %v1200_v16 = vpop.f32.mrb[5].mxu0  ;;  %v5017_v27 = vpop.f32.mrb[21].mxu1  ;;  %v1287_v49 = vadd.f32 %v6268_v19, %v1269_v13 }
 0x355   :  { %v5606_v33 = vadd.f32 %v1200_v16, %v6261_v5 }
 0x356   :  { %v4732_v31 = vmul.f32 -1.442695, %v5605_v26 }
 0x357   :  { %v4733_v57 = vmul.f32 -1.442695, %v5606_v33 }
 0x358   :  { %5708 = vpow2.f32 %v4732_v31 }
 0x359   :  { %5710 = vpow2.f32 %v4733_v57 }
 0x35b   :  { %v1444_v35 = vpop.f32.mrb[22].mxu1 }
 0x35c   :  { %v5028_v36 = vpop.f32.mrb[23].mxu1  ;;  %v1445_v57 = vadd.f32 %v1444_v35, %v6399_v50 }
 0x362   :  { %v5709_v24 = vpop.eup %5708 }
 0x363   :  { %v1281_v61 = vadd.f32 1.0, %v5709_v24  ;;  %v5711_v37 = vpop.eup %5710 }
 0x364   :  { %v1282_v38 = vadd.f32 1.0, %v5711_v37 }
 0x365   :  { %5712 = vrcp.f32 %v1281_v61 }
 0x366   :  { %5714 = vrcp.f32 %v1282_v38 }
 0x36b   :  { %v1529_v40 = vpop.f32.mrb[14].mxu0  ;;  %v1600_v52 = vpop.f32.mrb[24].mxu1 }
 0x36c   :  { %v5623_v32 = vadd.f32 %v1529_v40, %v6375_v10  ;;  %v1531_v54 = vpop.f32.mrb[15].mxu0  ;;  %v5039_v9 = vpop.f32.mrb[25].mxu1 }
 0x36d   :  { %v5624_v44 = vadd.f32 %v1531_v54, %v6379_v18  ;;  %v2147_v54 = vld [vmem:[#allocation7 + $0x20] sm:$0xff] }
 0x36e   :  { %v4738_v12 = vmul.f32 -1.442695, %v5623_v32  ;;  %v2144_v32 = vld [vmem:[#allocation7 + $0x8] sm:$0xff] }
 0x36f   :  { %v5713_v41 = vpop.eup %5712  ;;  %v4739_v6 = vmul.f32 -1.442695, %v5624_v44  ;;  %v6500_v9 = vpack.c.bf16 %v2147_v54, %v2144_v32  ;;  %v2153_v44 = vld [vmem:[#allocation7 + $0x50] sm:$0xff] }
 0x370   :  { %v1288_v45 = vmul.f32 %v5713_v41, %v1287_v49  ;;  %5716 = vpow2.f32 %v4738_v12  ;;  %v5715_v14 = vpop.eup %5714  ;;  %v2143_v49 = vld [vmem:[#allocation7] sm:$0xff]  ;;  %v2146_v12 = vld [vmem:[#allocation7 + $0x18] sm:$0xff] }
 0x371   :  { %v1291_v11 = vsub.f32 1.0, %v5715_v14  ;;  %v1293_v13 = vmul.f32 %v5715_v14, %v6386_v59  ;;  %v1618_v59 = vadd.f32 %v6391_v4, %v1600_v52  ;;  %v6502_v41 = vpack.c.bf16 %v2146_v12, %v2143_v49 }
 0x372   :  { %v1289_v62 = vadd.f32 %v1288_v45, %v6243_v55 }
 0x374   :  { %5718 = vtanh.f32 %v1289_v62  ;;  %v2149_v62 = vld [vmem:[#allocation7 + $0x30] sm:$0xff] }
 0x375   :  { %5720 = vpow2.f32 %v4739_v6 }
 0x37a   :  { %v5717_v20 = vpop.eup %5716 }
 0x37b   :  { %v1612_v21 = vadd.f32 1.0, %v5717_v20 }
 0x37d   :  { %5722 = vrcp.f32 %v1612_v21 }
 0x37e   :  { %v5719_v26 = vpop.eup %5718 }
 0x37f   :  { %v1292_v16 = vmul.f32 %v5719_v26, %v1291_v11  ;;  %v5721_v27 = vpop.eup %5720 }
 0x380   :  { %v1613_v55 = vadd.f32 1.0, %v5721_v27 }
 0x381   :  { %v6453_v31 = vadd.f32 %v1293_v13, %v1292_v16 }
 0x382   :  { %5724 = vrcp.f32 %v1613_v55 }
 0x383   :  { %4740 = vmatmul.mubr.msk.f32.vlgmr.msra.gmra.mrb[6].mxu0 %vm449_vm2, %v6453_v31  ;;  %5049 = vmatmul.mubr.msk.f32.vlgmr.msra.gmra.mrb[26].mxu1 %vm449_vm2, %v6453_v31 }
 0x384   :  { %5370 = vmatpush1.bf16.msra.mxu0 %v6283_v48  ;;  %5377 = vmatpush3.bf16.msra.mxu1 %v6319_v8 }
 0x385   :  { %5372 = vmatprep.subr.bf16.mxu0 %v6287_v51  ;;  %5378 = vmatprep.subr.bf16.mxu1 %v5990_v30 }
 0x386   :  { %1884 = vmatprep.mubr.f32.mxu0 %v5989_v0  ;;  %5059 = vmatprep.mubr.msk.f32.mxu1 %vm5991_vm1, %v5989_v0 }
 0x387   :  { %v5723_v33 = vpop.eup %5722 }
 0x388   :  { %v1619_v36 = vmul.f32 %v5723_v33, %v1618_v59  ;;  %5374 = vmatpush1.bf16.msra.mxu0 %v6302_v2  ;;  %5380 = vmatpush3.bf16.msra.mxu1 %v6333_v15 }
 0x389   :  { %5382 = vmatprep.subr.bf16.mxu0 %v6338_v17  ;;  %5389 = vmatprep.subr.bf16.mxu1 %v5990_v30 }
 0x38a   :  { %v1620_v24 = vadd.f32 %v1619_v36, %v1445_v57 }
 0x38b   :  { %4744 = vmatmul.mubr.msk.f32.vlgmr.msra.gmra.mrb[16].mxu0 %vm449_vm2, %v6453_v31  ;;  %5060 = vmatmul.mubr.msk.f32.vlgmr.msra.gmra.mrb[28].mxu1 %vm449_vm2, %v6453_v31 }
 0x38c   :  { %5726 = vtanh.f32 %v1620_v24  ;;  %5384 = vmatpush1.bf16.msra.mxu0 %v6345_v23  ;;  %5391 = vmatpush3.bf16.msra.mxu1 %v6295_v56  ;;  %v5725_v35 = vpop.eup %5724 }
 0x38d   :  { %5386 = vmatprep.subr.bf16.mxu0 %v6348_v25  ;;  %5392 = vmatprep.subr.bf16.mxu1 %v5990_v30  ;;  %v1622_v61 = vsub.f32 1.0, %v5725_v35  ;;  %v1624_v40 = vmul.f32 %v5725_v35, %v6429_v22 }
 0x38e   :  { %2040 = vmatprep.mubr.f32.mxu0 %v5989_v0  ;;  %5070 = vmatprep.mubr.msk.f32.mxu1 %vm5991_vm1, %v5989_v0 }
 0x390   :  { %5388 = vmatpush1.bf16.msra.mxu0 %v6355_v28  ;;  %5394 = vmatpush3.bf16.msra.mxu1 %v6313_v7 }
 0x391   :  { %5403 = vmatprep.subr.bf16.mxu1 %v5990_v30  ;;  %5396 = vmatprep.subr.bf16.mxu0 %v6500_v9 }
 0x396   :  { %v5727_v37 = vpop.eup %5726 }
 0x397   :  { %v1623_v38 = vmul.f32 %v5727_v37, %v1622_v61 }
 0x399   :  { %v6487_v52 = vadd.f32 %v1624_v40, %v1623_v38 }
 0x39b   :  { %4746 = vmatmul.mubr.msk.f32.vlgmr.msra.gmra.mrb[16].mxu0 %vm449_vm2, %v6487_v52  ;;  %5071 = vmatmul.mubr.msk.f32.vlgmr.msra.gmra.mrb[30].mxu1 %vm449_vm2, %v6487_v52 }
 0x39c   :  { %5405 = vmatpush3.bf16.msra.mxu1 %v6168_v29  ;;  %2222 = vmatprep.mubr.f32.mxu0 %v5989_v0  ;;  %v2150_v29 = vld [vmem:[#allocation7 + $0x38] sm:$0xff] }
 0x39d   :  { %5406 = vmatprep.subr.bf16.mxu1 %v5990_v30  ;;  %5081 = vmatprep.mubr.msk.f32.mxu1 %vm5991_vm1, %v5989_v0  ;;  %v6506_v45 = vpack.c.bf16 %v2153_v44, %v2150_v29 }
 0x39e   :  { %5398 = vmatpush1.bf16.msra.mxu0 %v6502_v41 }
 0x39f   :  { %5400 = vmatprep.subr.bf16.mxu0 %v6506_v45 }
 0x3a0   :  { %5408 = vmatpush3.bf16.msra.mxu1 %v6182_v34  ;;  %v2152_v34 = vld [vmem:[#allocation7 + $0x48] sm:$0xff] }
 0x3a1   :  { %5417 = vmatprep.subr.bf16.mxu1 %v5990_v30  ;;  %v6508_v6 = vpack.c.bf16 %v2152_v34, %v2149_v62 }
 0x3a3   :  { %5402 = vmatpush1.bf16.msra.mxu0 %v6508_v6 }
 0x3a4   :  { %5410 = vmatprep.subr.bf16.mxu0 %v6223_v39 }
 0x456   :  { %v1711_v14 = vpop.f32.mrb[6].mxu0  ;;  %v1782_v20 = vpop.f32.mrb[26].mxu1 }
 0x457   :  { %v5607_v21 = vadd.f32 %v1711_v14, %v6253_v63  ;;  %v1713_v11 = vpop.f32.mrb[7].mxu0  ;;  %v5050_v26 = vpop.f32.mrb[27].mxu1  ;;  %v1800_v40 = vadd.f32 %v6268_v19, %v1782_v20 }
 0x458   :  { %v5608_v13 = vadd.f32 %v1713_v11, %v6261_v5 }
 0x459   :  { %v4742_v16 = vmul.f32 -1.442695, %v5607_v21 }
 0x45a   :  { %v4743_v27 = vmul.f32 -1.442695, %v5608_v13 }
 0x45b   :  { %5728 = vpow2.f32 %v4742_v16 }
 0x45c   :  { %5730 = vpow2.f32 %v4743_v27 }
 0x45e   :  { %v1957_v55 = vpop.f32.mrb[28].mxu1 }
 0x45f   :  { %v5061_v59 = vpop.f32.mrb[29].mxu1 }
 0x460   :  { %v1958_v59 = vadd.f32 %v1957_v55, %v6399_v50  ;;  %v2667_v55 = vld [vmem:[#allocation7 + $0x58] sm:$0xff] }
 0x465   :  { %v5729_v33 = vpop.eup %5728 }
 0x466   :  { %v1794_v57 = vadd.f32 1.0, %v5729_v33  ;;  %v5731_v36 = vpop.eup %5730 }
 0x467   :  { %v1795_v24 = vadd.f32 1.0, %v5731_v36  ;;  %v2835_v36 = vld [vmem:[%s6894_s5 + $0x8] sm:$0xff] }
 0x468   :  { %5732 = vrcp.f32 %v1794_v57 }
 0x469   :  { %5734 = vrcp.f32 %v1795_v24  ;;  %v2838_v24 = vld [vmem:[%s6894_s5 + $0x20] sm:$0xff] }
 0x46e   :  { %v2042_v39 = vpop.f32.mrb[16].mxu0  ;;  %v2113_v35 = vpop.f32.mrb[30].mxu1 }
 0x46f   :  { %v5625_v61 = vadd.f32 %v2042_v39, %v6375_v10  ;;  %v2044_v37 = vpop.f32.mrb[17].mxu0  ;;  %v5072_v38 = vpop.f32.mrb[31].mxu1  ;;  %v6580_v39 = vpack.c.bf16 %v2838_v24, %v2835_v36  ;;  %v2844_v36 = vld [vmem:[%s6894_s5 + $0x50] sm:$0xff] }
 0x470   :  { %v5626_v49 = vadd.f32 %v2044_v37, %v6379_v18 }
 0x471   :  { %v4748_v32 = vmul.f32 -1.442695, %v5625_v61 }
 0x472   :  { %v5733_v54 = vpop.eup %5732  ;;  %v4749_v44 = vmul.f32 -1.442695, %v5626_v49 }
 0x473   :  { %v1801_v12 = vmul.f32 %v5733_v54, %v1800_v40  ;;  %5736 = vpow2.f32 %v4748_v32  ;;  %v5735_v62 = vpop.eup %5734 }
 0x474   :  { %v1804_v21 = vsub.f32 1.0, %v5735_v62  ;;  %v1806_v20 = vmul.f32 %v5735_v62, %v6453_v31  ;;  %v2131_v31 = vadd.f32 %v6391_v4, %v2113_v35 }
 0x475   :  { %v1802_v29 = vadd.f32 %v1801_v12, %v6241_v53 }
 0x477   :  { %5738 = vtanh.f32 %v1802_v29 }
 0x478   :  { %5740 = vpow2.f32 %v4749_v44 }
 0x47d   :  { %v5737_v34 = vpop.eup %5736 }
 0x47e   :  { %v2125_v14 = vadd.f32 1.0, %v5737_v34 }
 0x480   :  { %5742 = vrcp.f32 %v2125_v14 }
 0x481   :  { %v5739_v11 = vpop.eup %5738 }
 0x482   :  { %v1805_v26 = vmul.f32 %v5739_v11, %v1804_v21  ;;  %v5741_v16 = vpop.eup %5740 }
 0x483   :  { %v2126_v53 = vadd.f32 1.0, %v5741_v16 }
 0x484   :  { %v6520_v13 = vadd.f32 %v1806_v20, %v1805_v26 }
 0x485   :  { %5744 = vrcp.f32 %v2126_v53 }
 0x486   :  { %4750 = vmatmul.mubr.msk.f32.vlgmr.msra.gmra.mrb[8].mxu0 %vm449_vm2, %v6520_v13  ;;  %5082 = vmatmul.mubr.msk.f32.vlgmr.msra.gmra.mrb[32].mxu1 %vm449_vm2, %v6520_v13 }
 0x487   :  { %5412 = vmatpush1.bf16.msra.mxu0 %v6283_v48  ;;  %5419 = vmatpush3.bf16.msra.mxu1 %v6319_v8 }
 0x488   :  { %5414 = vmatprep.subr.bf16.mxu0 %v6287_v51  ;;  %5420 = vmatprep.subr.bf16.mxu1 %v5990_v30 }
 0x489   :  { %2397 = vmatprep.mubr.f32.mxu0 %v5989_v0  ;;  %5092 = vmatprep.mubr.msk.f32.mxu1 %vm5991_vm1, %v5989_v0 }
 0x48a   :  { %v5743_v27 = vpop.eup %5742 }
 0x48b   :  { %v2132_v33 = vmul.f32 %v5743_v27, %v2131_v31  ;;  %5416 = vmatpush1.bf16.msra.mxu0 %v6302_v2  ;;  %5422 = vmatpush3.bf16.msra.mxu1 %v6333_v15 }
 0x48c   :  { %5424 = vmatprep.subr.bf16.mxu0 %v6338_v17  ;;  %5431 = vmatprep.subr.bf16.mxu1 %v5990_v30 }
 0x48d   :  { %v2133_v48 = vadd.f32 %v2132_v33, %v1958_v59 }
 0x48e   :  { %4754 = vmatmul.mubr.msk.f32.vlgmr.msra.gmra.mrb[18].mxu0 %vm449_vm2, %v6520_v13  ;;  %5093 = vmatmul.mubr.msk.f32.vlgmr.msra.gmra.mrb[34].mxu1 %vm449_vm2, %v6520_v13 }
 0x48f   :  { %5746 = vtanh.f32 %v2133_v48  ;;  %5426 = vmatpush1.bf16.msra.mxu0 %v6345_v23  ;;  %5433 = vmatpush3.bf16.msra.mxu1 %v6295_v56  ;;  %v5745_v51 = vpop.eup %5744  ;;  %v2661_v23 = vld [vmem:[#allocation7 + $0x28] sm:$0xff] }
 0x490   :  { %5428 = vmatprep.subr.bf16.mxu0 %v6348_v25  ;;  %5434 = vmatprep.subr.bf16.mxu1 %v5990_v30  ;;  %v2135_v2 = vsub.f32 1.0, %v5745_v51  ;;  %v2137_v15 = vmul.f32 %v5745_v51, %v6487_v52 }
 0x491   :  { %2553 = vmatprep.mubr.f32.mxu0 %v5989_v0  ;;  %5103 = vmatprep.mubr.msk.f32.mxu1 %vm5991_vm1, %v5989_v0 }
 0x493   :  { %5430 = vmatpush1.bf16.msra.mxu0 %v6355_v28  ;;  %5436 = vmatpush3.bf16.msra.mxu1 %v6313_v7  ;;  %v2658_v7 = vld [vmem:[#allocation7 + $0x10] sm:$0xff]  ;;  %v2664_v28 = vld [vmem:[#allocation7 + $0x40] sm:$0xff] }
 0x494   :  { %5438 = vmatprep.subr.bf16.mxu0 %v6500_v9  ;;  %5445 = vmatprep.subr.bf16.mxu1 %v5990_v30  ;;  %v6567_v25 = vpack.c.bf16 %v2661_v23, %v2658_v7  ;;  %v6571_v57 = vpack.c.bf16 %v2667_v55, %v2664_v28  ;;  %v2837_v7 = vld [vmem:[%s6894_s5 + $0x18] sm:$0xff]  ;;  %v2839_v23 = vld [vmem:[%s6894_s5 + $0x28] sm:$0xff] }
 0x495   :  { %v2841_v55 = vld [vmem:[%s6894_s5 + $0x38] sm:$0xff] }
 0x499   :  { %v5747_v56 = vpop.eup %5746 }
 0x49a   :  { %v2136_v8 = vmul.f32 %v5747_v56, %v2135_v2 }
 0x49c   :  { %v6555_v17 = vadd.f32 %v2137_v15, %v2136_v8  ;;  %v2834_v15 = vld [vmem:[%s6894_s5] sm:$0xff] }
 0x49e   :  { %4756 = vmatmul.mubr.msk.f32.vlgmr.msra.gmra.mrb[18].mxu0 %vm449_vm2, %v6555_v17  ;;  %5104 = vmatmul.mubr.msk.f32.vlgmr.msra.gmra.mrb[36].mxu1 %vm449_vm2, %v6555_v17 }
 0x49f   :  { %5440 = vmatpush1.bf16.msra.mxu0 %v6502_v41  ;;  %2735 = vmatprep.mubr.f32.mxu0 %v5989_v0 }
 0x4a0   :  { %5442 = vmatprep.subr.bf16.mxu0 %v6506_v45  ;;  %5114 = vmatprep.mubr.msk.f32.mxu1 %vm5991_vm1, %v5989_v0 }
 0x4a1   :  { %5447 = vmatpush3.bf16.msra.mxu1 %v6567_v25 }
 0x4a2   :  { %5448 = vmatprep.subr.bf16.mxu1 %v5990_v30 }
 0x4a3   :  { %5444 = vmatpush1.bf16.msra.mxu0 %v6508_v6 }
 0x4a4   :  { %5452 = vmatprep.subr.bf16.mxu0 %v6580_v39 }
 0x4a5   :  { %5450 = vmatpush3.bf16.msra.mxu1 %v6571_v57 }
 0x4a6   :  { %5459 = vmatprep.subr.bf16.mxu1 %v5990_v30 }
 0x559   :  { %v2224_v35 = vpop.f32.mrb[8].mxu0  ;;  %v2295_v61 = vpop.f32.mrb[32].mxu1 }
 0x55a   :  { %v5609_v37 = vadd.f32 %v2224_v35, %v6253_v63  ;;  %v2226_v38 = vpop.f32.mrb[9].mxu0  ;;  %v5083_v40 = vpop.f32.mrb[33].mxu1  ;;  %v2313_v53 = vadd.f32 %v6268_v19, %v2295_v61  ;;  %v6611_v61 = vpack.c.bf16 %v2837_v7, %v2834_v15  ;;  %v2995_v7 = vld [vmem:[#allocation10 + $0x40] sm:$0xff] }
 0x55b   :  { %v5610_v54 = vadd.f32 %v2226_v38, %v6261_v5  ;;  %v2840_v38 = vld [vmem:[%s6894_s5 + $0x30] sm:$0xff] }
 0x55c   :  { %v4752_v32 = vmul.f32 -1.442695, %v5609_v37 }
 0x55d   :  { %v4753_v49 = vmul.f32 -1.442695, %v5610_v54  ;;  %v6620_v54 = vpack.c.bf16 %v2844_v36, %v2841_v55 }
 0x55e   :  { %5748 = vpow2.f32 %v4752_v32 }
 0x55f   :  { %5750 = vpow2.f32 %v4753_v49  ;;  %v2843_v49 = vld [vmem:[%s6894_s5 + $0x48] sm:$0xff] }
 0x561   :  { %v6586_v12 = vpop.f32.mrb[34].mxu1 }
 0x562   :  { %v5094_v29 = vpop.f32.mrb[35].mxu1 }
 0x563   :  { %v2845_v29 = vld [vmem:[%s6894_s5 + $0x58] sm:$0xff] }
 0x568   :  { %v5749_v44 = vpop.eup %5748 }
 0x569   :  { %v2307_v62 = vadd.f32 1.0, %v5749_v44  ;;  %v5751_v34 = vpop.eup %5750  ;;  %v2988_v44 = vld [vmem:[#allocation10 + $0x8] sm:$0xff] }
 0x56a   :  { %v2308_v14 = vadd.f32 1.0, %v5751_v34 }
 0x56b   :  { %5752 = vrcp.f32 %v2307_v62  ;;  %v2991_v62 = vld [vmem:[#allocation10 + $0x20] sm:$0xff] }
 0x56c   :  { %5754 = vrcp.f32 %v2308_v14  ;;  %v6637_v14 = vpack.c.bf16 %v2843_v49, %v2840_v38 }
 0x571   :  { %v2555_v21 = vpop.f32.mrb[18].mxu0  ;;  %v2626_v11 = vpop.f32.mrb[36].mxu1 }
 0x572   :  { %v5627_v26 = vadd.f32 %v2555_v21, %v6375_v10  ;;  %v2557_v20 = vpop.f32.mrb[19].mxu0  ;;  %v5105_v16 = vpop.f32.mrb[37].mxu1 }
 0x573   :  { %v5628_v59 = vadd.f32 %v2557_v20, %v6379_v18  ;;  %v2990_v20 = vld [vmem:[#allocation10 + $0x18] sm:$0xff]  ;;  %v6643_v16 = vpack.c.bf16 %v2991_v62, %v2988_v44 }
 0x574   :  { %v4758_v31 = vmul.f32 -1.442695, %v5627_v26  ;;  %v2987_v26 = vld [vmem:[#allocation10] sm:$0xff] }
 0x575   :  { %v5753_v27 = vpop.eup %5752  ;;  %v4759_v51 = vmul.f32 -1.442695, %v5628_v59  ;;  %v2994_v59 = vld [vmem:[#allocation10 + $0x38] sm:$0xff] }
 0x576   :  { %v2314_v33 = vmul.f32 %v5753_v27, %v2313_v53  ;;  %5756 = vpow2.f32 %v4758_v31  ;;  %v5755_v2 = vpop.eup %5754  ;;  %v2989_v53 = vld [vmem:[#allocation10 + $0x10] sm:$0xff]  ;;  %v2992_v31 = vld [vmem:[#allocation10 + $0x28] sm:$0xff]  ;;  %v2644_v27 = vadd.f32 %v6391_v4, %v2626_v11 }
 0x577   :  { %v2317_v19 = vsub.f32 1.0, %v5755_v2  ;;  %v2319_v35 = vmul.f32 %v5755_v2, %v6520_v13  ;;  %v2842_v13 = vld [vmem:[%s6894_s5 + $0x40] sm:$0xff]  ;;  %v2471_v2 = vadd.f32 %v6586_v12, %v6399_v50  ;;  %v6655_v11 = vpack.c.bf16 %v2992_v31, %v2989_v53 }
 0x578   :  { %v2315_v48 = vadd.f32 %v2314_v33, %v6248_v60  ;;  %v2836_v60 = vld [vmem:[%s6894_s5 + $0x10] sm:$0xff]  ;;  %v6639_v21 = vpack.c.bf16 %v2845_v29, %v2842_v13  ;;  %v2997_v33 = vld [vmem:[#allocation10 + $0x50] sm:$0xff] }
 0x579   :  { %v6613_v37 = vpack.c.bf16 %v2839_v23, %v2836_v60  ;;  %v6659_v15 = vpack.c.bf16 %v2997_v33, %v2994_v59  ;;  %v2998_v60 = vld [vmem:[#allocation10 + $0x58] sm:$0xff] }
 0x57a   :  { %5758 = vtanh.f32 %v2315_v48 }
 0x57b   :  { %5760 = vpow2.f32 %v4759_v51  ;;  %v6649_v51 = vpack.c.bf16 %v2990_v20, %v2987_v26 }
 0x580   :  { %v5757_v56 = vpop.eup %5756 }
 0x581   :  { %v2638_v8 = vadd.f32 1.0, %v5757_v56 }
 0x583   :  { %5762 = vrcp.f32 %v2638_v8  ;;  %v2993_v8 = vld [vmem:[#allocation10 + $0x30] sm:$0xff] }
 0x584   :  { %v5759_v28 = vpop.eup %5758 }
 0x585   :  { %v2318_v24 = vmul.f32 %v5759_v28, %v2317_v19  ;;  %v5761_v40 = vpop.eup %5760  ;;  %v2996_v19 = vld [vmem:[#allocation10 + $0x48] sm:$0xff]  ;;  %v6669_v28 = vpack.c.bf16 %v2998_v60, %v2995_v7 }
 0x586   :  { %v2639_v34 = vadd.f32 1.0, %v5761_v40  ;;  %v6667_v12 = vpack.c.bf16 %v2996_v19, %v2993_v8  ;;  %v6704_v60 = vld [vmem:[%s6893_s4] ss:$0 sm:$0xff] }
 0x587   :  { %v6618_v32 = vadd.f32 %v2319_v35, %v2318_v24 }
 0x588   :  { %5764 = vrcp.f32 %v2639_v34 }
 0x589   :  { %4760 = vmatmul.mubr.msk.f32.vlgmr.msra.gmra.mrb[10].mxu0 %vm449_vm2, %v6618_v32  ;;  %5115 = vmatmul.mubr.msk.f32.vlgmr.msra.gmra.mrb[38].mxu1 %vm449_vm2, %v6618_v32 }
 0x58a   :  { %5454 = vmatpush1.bf16.msra.mxu0 %v6611_v61  ;;  %5461 = vmatpush3.bf16.msra.mxu1 %v6613_v37 }
 0x58b   :  { %5456 = vmatprep.subr.bf16.mxu0 %v6620_v54  ;;  %5462 = vmatprep.subr.bf16.mxu1 %v5990_v30 }
 0x58c   :  { %2910 = vmatprep.mubr.f32.mxu0 %v5989_v0  ;;  %5125 = vmatprep.mubr.msk.f32.mxu1 %vm5991_vm1, %v5989_v0 }
 0x58d   :  { %v5763_v48 = vpop.eup %5762 }
 0x58e   :  { %v2645_v56 = vmul.f32 %v5763_v48, %v2644_v27  ;;  %5458 = vmatpush1.bf16.msra.mxu0 %v6637_v14  ;;  %5464 = vmatpush3.bf16.msra.mxu1 %v6639_v21 }
 0x58f   :  { %5466 = vmatprep.subr.bf16.mxu0 %v6643_v16  ;;  %5473 = vmatprep.subr.bf16.mxu1 %v5990_v30 }
 0x590   :  { %v2646_v23 = vadd.f32 %v2645_v56, %v2471_v2 }
 0x591   :  { %4764 = vmatmul.mubr.msk.f32.vlgmr.msra.gmra.mrb[20].mxu0 %vm449_vm2, %v6618_v32  ;;  %5126 = vmatmul.mubr.msk.f32.vlgmr.msra.gmra.mrb[40].mxu1 %vm449_vm2, %v6618_v32 }
 0x592   :  { %5766 = vtanh.f32 %v2646_v23  ;;  %5468 = vmatpush1.bf16.msra.mxu0 %v6649_v51  ;;  %5475 = vmatpush3.bf16.msra.mxu1 %v6655_v11  ;;  %v5765_v55 = vpop.eup %5764 }
 0x593   :  { %5470 = vmatprep.subr.bf16.mxu0 %v6659_v15  ;;  %5476 = vmatprep.subr.bf16.mxu1 %v5990_v30  ;;  %v2648_v36 = vsub.f32 1.0, %v5765_v55  ;;  %v2650_v38 = vmul.f32 %v5765_v55, %v6555_v17 }
 0x594   :  { %3066 = vmatprep.mubr.f32.mxu0 %v5989_v0  ;;  %5136 = vmatprep.mubr.msk.f32.mxu1 %vm5991_vm1, %v5989_v0 }
 0x596   :  { %5472 = vmatpush1.bf16.msra.mxu0 %v6667_v12  ;;  %5478 = vmatpush3.bf16.msra.mxu1 %v6669_v28 }
 0x597   :  { %5480 = vmatprep.subr.bf16.mxu0 %v6500_v9  ;;  %5487 = vmatprep.subr.bf16.mxu1 %v5990_v30 }
 0x59c   :  { %v5767_v24 = vpop.eup %5766 }
 0x59d   :  { %v2649_v35 = vmul.f32 %v5767_v24, %v2648_v36 }
 0x59f   :  { %v6681_v40 = vadd.f32 %v2650_v38, %v2649_v35 }
 0x5a1   :  { %4766 = vmatmul.mubr.msk.f32.vlgmr.msra.gmra.mrb[20].mxu0 %vm449_vm2, %v6681_v40  ;;  %5137 = vmatmul.mubr.msk.f32.vlgmr.msra.gmra.mrb[42].mxu1 %vm449_vm2, %v6681_v40 }
 0x5a2   :  { %5482 = vmatpush1.bf16.msra.mxu0 %v6502_v41  ;;  %5489 = vmatpush3.bf16.msra.mxu1 %v6567_v25 }
 0x5a3   :  { %5484 = vmatprep.subr.bf16.mxu0 %v6506_v45  ;;  %5490 = vmatprep.subr.bf16.mxu1 %v5990_v30 }
 0x5a4   :  { %3248 = vmatprep.mubr.f32.mxu0 %v5989_v0  ;;  %5147 = vmatprep.mubr.msk.f32.mxu1 %vm5991_vm1, %v5989_v0 }
 0x5a6   :  { %5486 = vmatpush1.bf16.msra.mxu0 %v6508_v6  ;;  %5492 = vmatpush3.bf16.msra.mxu1 %v6571_v57 }
 0x5a7   :  { %5494 = vmatprep.subr.bf16.mxu0 %v6580_v39  ;;  %5501 = vmatprep.subr.bf16.mxu1 %v5990_v30 }
 0x65c   :  { %v2737_v49 = vpop.f32.mrb[10].mxu0  ;;  %v2808_v13 = vpop.f32.mrb[38].mxu1 }
 0x65d   :  { %v5611_v29 = vadd.f32 %v2737_v49, %v6253_v63  ;;  %v2739_v44 = vpop.f32.mrb[11].mxu0  ;;  %v5116_v62 = vpop.f32.mrb[39].mxu1  ;;  %v2826_v23 = vadd.f32 %v6704_v60, %v2808_v13 }
 0x65e   :  { %v5612_v26 = vadd.f32 %v2739_v44, %v6261_v5 }
 0x65f   :  { %v4762_v34 = vmul.f32 -1.442695, %v5611_v29 }
 0x660   :  { %v4763_v20 = vmul.f32 -1.442695, %v5612_v26 }
 0x661   :  { %5768 = vpow2.f32 %v4762_v34 }
 0x662   :  { %5770 = vpow2.f32 %v4763_v20 }
 0x664   :  { %v2983_v53 = vpop.f32.mrb[40].mxu1 }
 0x665   :  { %v5127_v31 = vpop.f32.mrb[41].mxu1 }
 0x66b   :  { %v5769_v27 = vpop.eup %5768 }
 0x66c   :  { %v2820_v59 = vadd.f32 1.0, %v5769_v27  ;;  %v5771_v33 = vpop.eup %5770 }
 0x66d   :  { %v2821_v48 = vadd.f32 1.0, %v5771_v33  ;;  %v2984_v33 = vadd.f32 %v2983_v53, %v6399_v50 }
 0x66e   :  { %5772 = vrcp.f32 %v2820_v59 }
 0x66f   :  { %5774 = vrcp.f32 %v2821_v48 }
 0x674   :  { %v3068_v2 = vpop.f32.mrb[20].mxu0  ;;  %v3139_v56 = vpop.f32.mrb[42].mxu1 }
 0x675   :  { %v5629_v8 = vadd.f32 %v3068_v2, %v6375_v10  ;;  %v3070_v19 = vpop.f32.mrb[21].mxu0  ;;  %v5138_v7 = vpop.f32.mrb[43].mxu1 }
 0x676   :  { %v5630_v24 = vadd.f32 %v3070_v19, %v6379_v18 }
 0x677   :  { %v4768_v55 = vmul.f32 -1.442695, %v5629_v8 }
 0x678   :  { %v5773_v36 = vpop.eup %5772  ;;  %v4769_v49 = vmul.f32 -1.442695, %v5630_v24 }
 0x679   :  { %v2827_v35 = vmul.f32 %v5773_v36, %v2826_v23  ;;  %5776 = vpow2.f32 %v4768_v55  ;;  %v5775_v29 = vpop.eup %5774 }
 0x67a   :  { %v2830_v34 = vsub.f32 1.0, %v5775_v29  ;;  %v2832_v13 = vmul.f32 %v5775_v29, %v6618_v32  ;;  %v3157_v32 = vadd.f32 %v6391_v4, %v3139_v56 }
 0x67b   :  { %v2828_v38 = vadd.f32 %v2827_v35, %v6246_v58 }
 0x67d   :  { %5778 = vtanh.f32 %v2828_v38 }
 0x67e   :  { %5780 = vpow2.f32 %v4769_v49 }
 0x683   :  { %v5777_v44 = vpop.eup %5776 }
 0x684   :  { %v3151_v62 = vadd.f32 1.0, %v5777_v44 }
 0x686   :  { %5782 = vrcp.f32 %v3151_v62 }
 0x687   :  { %v5779_v26 = vpop.eup %5778 }
 0x688   :  { %v2831_v20 = vmul.f32 %v5779_v26, %v2830_v34  ;;  %v5781_v31 = vpop.eup %5780 }
 0x689   :  { %v3152_v58 = vadd.f32 1.0, %v5781_v31 }
 0x68a   :  { %v6710_v27 = vadd.f32 %v2832_v13, %v2831_v20 }
 0x68b   :  { %5784 = vrcp.f32 %v3152_v58 }
 0x68c   :  { %4770 = vmatmul.mubr.msk.f32.vlgmr.msra.gmra.mrb[22].mxu0 %vm449_vm2, %v6710_v27  ;;  %5148 = vmatmul.mubr.msk.f32.vlgmr.msra.gmra.mrb[44].mxu1 %vm449_vm2, %v6710_v27 }
 0x68d   :  { %5496 = vmatpush1.bf16.msra.mxu0 %v6611_v61  ;;  %5503 = vmatpush3.bf16.msra.mxu1 %v6613_v37 }
 0x68e   :  { %5498 = vmatprep.subr.bf16.mxu0 %v6620_v54  ;;  %5504 = vmatprep.subr.bf16.mxu1 %v5990_v30 }
 0x68f   :  { %3423 = vmatprep.mubr.f32.mxu0 %v5989_v0  ;;  %5158 = vmatprep.mubr.msk.f32.mxu1 %vm5991_vm1, %v5989_v0 }
 0x690   :  { %v5783_v59 = vpop.eup %5782 }
 0x691   :  { %v3158_v48 = vmul.f32 %v5783_v59, %v3157_v32  ;;  %5500 = vmatpush1.bf16.msra.mxu0 %v6637_v14  ;;  %5506 = vmatpush3.bf16.msra.mxu1 %v6639_v21 }
 0x692   :  { %5508 = vmatprep.subr.bf16.mxu0 %v6643_v16  ;;  %5515 = vmatprep.subr.bf16.mxu1 %v5990_v30 }
 0x693   :  { %v3159_v2 = vadd.f32 %v3158_v48, %v2984_v33 }
 0x694   :  { %4774 = vmatmul.mubr.msk.f32.vlgmr.msra.gmra.mrb[24].mxu0 %vm449_vm2, %v6710_v27  ;;  %5159 = vmatmul.mubr.msk.f32.vlgmr.msra.gmra.mrb[46].mxu1 %vm449_vm2, %v6710_v27 }
 0x695   :  { %5786 = vtanh.f32 %v3159_v2  ;;  %5510 = vmatpush1.bf16.msra.mxu0 %v6649_v51  ;;  %5517 = vmatpush3.bf16.msra.mxu1 %v6655_v11  ;;  %v5785_v4 = vpop.eup %5784 }
 0x696   :  { %5512 = vmatprep.subr.bf16.mxu0 %v6659_v15  ;;  %5518 = vmatprep.subr.bf16.mxu1 %v5990_v30  ;;  %v3161_v53 = vsub.f32 1.0, %v5785_v4  ;;  %v3163_v19 = vmul.f32 %v5785_v4, %v6681_v40 }
 0x697   :  { %3579 = vmatprep.mubr.f32.mxu0 %v5989_v0  ;;  %5169 = vmatprep.mubr.msk.f32.mxu1 %vm5991_vm1, %v5989_v0 }
 0x699   :  { %5514 = vmatpush1.bf16.msra.mxu0 %v6667_v12  ;;  %5520 = vmatpush3.bf16.msra.mxu1 %v6669_v28 }
 0x69a   :  { %5522 = vmatprep.subr.bf16.mxu0 %v6500_v9  ;;  %5529 = vmatprep.subr.bf16.mxu1 %v5990_v30  ;;  %v264_v9 = vadd.f32 %v6228_v42, %v6253_v63 }
 0x69f   :  { %v5787_v56 = vpop.eup %5786 }
 0x6a0   :  { %v3162_v8 = vmul.f32 %v5787_v56, %v3161_v53 }
 0x6a2   :  { %v6745_v7 = vadd.f32 %v3163_v19, %v3162_v8 }
 0x6a4   :  { %4776 = vmatmul.mubr.msk.f32.vlgmr.msra.gmra.mrb[24].mxu0 %vm449_vm2, %v6745_v7  ;;  %5170 = vmatmul.mubr.msk.f32.vlgmr.msra.gmra.mrb[48].mxu1 %vm449_vm2, %v6745_v7 }
 0x6a5   :  { %5524 = vmatpush1.bf16.msra.mxu0 %v6502_v41  ;;  %5531 = vmatpush3.bf16.msra.mxu1 %v6567_v25  ;;  %v266_v41 = vadd.f32 %v6230_v43, %v6261_v5 }
 0x6a6   :  { %5526 = vmatprep.subr.bf16.mxu0 %v6506_v45  ;;  %5532 = vmatprep.subr.bf16.mxu1 %v5990_v30 }
 0x6a7   :  { %3761 = vmatprep.mubr.f32.mxu0 %v5989_v0  ;;  %5180 = vmatprep.mubr.msk.f32.mxu1 %vm5991_vm1, %v5989_v0 }
 0x6a9   :  { %5528 = vmatpush1.bf16.msra.mxu0 %v6508_v6  ;;  %5534 = vmatpush3.bf16.msra.mxu1 %v6571_v57 }
 0x6aa   :  { %5536 = vmatprep.subr.bf16.mxu0 %v6580_v39  ;;  %5543 = vmatprep.subr.bf16.mxu1 %v5990_v30 }
 0x75f   :  { %v3250_v45 = vpop.f32.mrb[22].mxu0  ;;  %v3321_v25 = vpop.f32.mrb[44].mxu1 }
 0x760   :  { %v3325_v23 = vadd.f32 %v3250_v45, %v264_v9  ;;  %v3252_v55 = vpop.f32.mrb[23].mxu0  ;;  %v5149_v36 = vpop.f32.mrb[45].mxu1  ;;  %v3339_v13 = vadd.f32 %v6704_v60, %v3321_v25 }
 0x761   :  { %v3326_v24 = vadd.f32 %v3252_v55, %v266_v41 }
 0x762   :  { %v4772_v35 = vmul.f32 -1.442695, %v3325_v23 }
 0x763   :  { %v4773_v6 = vmul.f32 -1.442695, %v3326_v24 }
 0x764   :  { %5788 = vpow2.f32 %v4772_v35 }
 0x765   :  { %5790 = vpow2.f32 %v4773_v6 }
 0x767   :  { %v3496_v57 = vpop.f32.mrb[46].mxu1 }
 0x768   :  { %v5160_v38 = vpop.f32.mrb[47].mxu1  ;;  %v3497_v55 = vadd.f32 %v3496_v57, %v6399_v50 }
 0x76e   :  { %v5789_v49 = vpop.eup %5788 }
 0x76f   :  { %v3333_v29 = vadd.f32 1.0, %v5789_v49  ;;  %v5791_v44 = vpop.eup %5790 }
 0x770   :  { %v3334_v42 = vadd.f32 1.0, %v5791_v44 }
 0x771   :  { %5792 = vrcp.f32 %v3333_v29 }
 0x772   :  { %5794 = vrcp.f32 %v3334_v42 }
 0x777   :  { %v3581_v62 = vpop.f32.mrb[24].mxu0  ;;  %v3652_v34 = vpop.f32.mrb[48].mxu1 }
 0x778   :  { %v5631_v43 = vadd.f32 %v3581_v62, %v6375_v10  ;;  %v3583_v26 = vpop.f32.mrb[25].mxu0  ;;  %v5171_v20 = vpop.f32.mrb[49].mxu1 }
 0x779   :  { %v5632_v32 = vadd.f32 %v3583_v26, %v6379_v18 }
 0x77a   :  { %v4778_v31 = vmul.f32 -1.442695, %v5631_v43 }
 0x77b   :  { %v5793_v58 = vpop.eup %5792  ;;  %v4779_v48 = vmul.f32 -1.442695, %v5632_v32 }
 0x77c   :  { %v3340_v59 = vmul.f32 %v5793_v58, %v3339_v13  ;;  %5796 = vpow2.f32 %v4778_v31  ;;  %v5795_v2 = vpop.eup %5794 }
 0x77d   :  { %v3343_v56 = vsub.f32 1.0, %v5795_v2  ;;  %v3345_v9 = vmul.f32 %v5795_v2, %v6710_v27  ;;  %v6784_v27 = vld [vmem:[%s6897_s8] ss:$0 sm:$0xff] }
 0x77e   :  { %v3341_v33 = vadd.f32 %v3340_v59, %v6257_v3  ;;  %v3670_v25 = vadd.f32 %v6784_v27, %v3652_v34 }
 0x780   :  { %5798 = vtanh.f32 %v3341_v33 }
 0x781   :  { %5800 = vpow2.f32 %v4779_v48 }
 0x786   :  { %v5797_v4 = vpop.eup %5796 }
 0x787   :  { %v3664_v53 = vadd.f32 1.0, %v5797_v4 }
 0x789   :  { %5802 = vrcp.f32 %v3664_v53 }
 0x78a   :  { %v5799_v8 = vpop.eup %5798 }
 0x78b   :  { %v3344_v19 = vmul.f32 %v5799_v8, %v3343_v56  ;;  %v5801_v41 = vpop.eup %5800 }
 0x78c   :  { %v3665_v3 = vadd.f32 1.0, %v5801_v41 }
 0x78d   :  { %v6771_v45 = vadd.f32 %v3345_v9, %v3344_v19 }
 0x78e   :  { %5804 = vrcp.f32 %v3665_v3 }
 0x78f   :  { %4780 = vmatmul.mubr.msk.f32.vlgmr.msra.gmra.mrb[26].mxu0 %vm449_vm2, %v6771_v45  ;;  %5181 = vmatmul.mubr.msk.f32.vlgmr.msra.gmra.mrb[50].mxu1 %vm449_vm2, %v6771_v45 }
 0x790   :  { %5538 = vmatpush1.bf16.msra.mxu0 %v6611_v61  ;;  %5545 = vmatpush3.bf16.msra.mxu1 %v6613_v37 }
 0x791   :  { %5540 = vmatprep.subr.bf16.mxu0 %v6620_v54  ;;  %5546 = vmatprep.subr.bf16.mxu1 %v5990_v30 }
 0x792   :  { %3936 = vmatprep.mubr.f32.mxu0 %v5989_v0  ;;  %5191 = vmatprep.mubr.msk.f32.mxu1 %vm5991_vm1, %v5989_v0 }
 0x793   :  { %v5803_v23 = vpop.eup %5802 }
 0x794   :  { %v3671_v36 = vmul.f32 %v5803_v23, %v3670_v25  ;;  %5542 = vmatpush1.bf16.msra.mxu0 %v6637_v14  ;;  %5548 = vmatpush3.bf16.msra.mxu1 %v6639_v21 }
 0x795   :  { %5550 = vmatprep.subr.bf16.mxu0 %v6643_v16  ;;  %5557 = vmatprep.subr.bf16.mxu1 %v5990_v30 }
 0x796   :  { %v3672_v24 = vadd.f32 %v3671_v36, %v3497_v55  ;;  %v4535_v55 = vld [vmem:[#allocation12] sm:$0xff]  ;;  %v4536_v36 = vld [vmem:[#allocation12 + $0x8] sm:$0xff] }
 0x797   :  { %4784 = vmatmul.mubr.msk.f32.vlgmr.msra.gmra.mrb[28].mxu0 %vm449_vm2, %v6771_v45  ;;  %5192 = vmatmul.mubr.msk.f32.vlgmr.msra.gmra.mrb[52].mxu1 %vm449_vm2, %v6771_v45 }
 0x798   :  { %5806 = vtanh.f32 %v3672_v24  ;;  %5552 = vmatpush1.bf16.msra.mxu0 %v6649_v51  ;;  %5559 = vmatpush3.bf16.msra.mxu1 %v6655_v11  ;;  %v5805_v35 = vpop.eup %5804  ;;  %v5591_v24 = vpack.c.bf16 %v4536_v36, %v4535_v55 }
 0x799   :  { %5554 = vmatprep.subr.bf16.mxu0 %v6659_v15  ;;  %5560 = vmatprep.subr.bf16.mxu1 %v5990_v30  ;;  %v3674_v6 = vsub.f32 1.0, %v5805_v35  ;;  %v3676_v49 = vmul.f32 %v5805_v35, %v6745_v7 }
 0x79a   :  { %4092 = vmatprep.mubr.f32.mxu0 %v5989_v0  ;;  %5202 = vmatprep.mubr.msk.f32.mxu1 %vm5991_vm1, %v5989_v0 }
 0x79c   :  { %5556 = vmatpush1.bf16.msra.mxu0 %v6667_v12  ;;  %5562 = vmatpush3.bf16.msra.mxu1 %v6669_v28 }
 0x79d   :  { %5564 = vmatprep.subr.bf16.mxu0 %v6580_v39  ;;  %5571 = vmatprep.subr.bf16.mxu1 %v5990_v30  ;;  %v270_v39 = vadd.f32 %v6233_v46, %v6253_v63 }
 0x7a2   :  { %v5807_v57 = vpop.eup %5806 }
 0x7a3   :  { %v3675_v38 = vmul.f32 %v5807_v57, %v3674_v6 }
 0x7a5   :  { %v6811_v29 = vadd.f32 %v3676_v49, %v3675_v38  ;;  %v4537_v38 = vld [vmem:[#allocation12 + $0x10] sm:$0xff]  ;;  %v4538_v49 = vld [vmem:[#allocation12 + $0x18] sm:$0xff] }
 0x7a7   :  { %4786 = vmatmul.mubr.msk.f32.vlgmr.msra.gmra.mrb[28].mxu0 %vm449_vm2, %v6811_v29  ;;  %5203 = vmatmul.mubr.msk.f32.vlgmr.msra.gmra.mrb[54].mxu1 %vm449_vm2, %v6811_v29 }
 0x7a8   :  { %5566 = vmatpush1.bf16.msra.mxu0 %v6611_v61  ;;  %5573 = vmatpush3.bf16.msra.mxu1 %v6613_v37  ;;  %v272_v61 = vadd.f32 %v6235_v47, %v6261_v5 }
 0x7a9   :  { %5568 = vmatprep.subr.bf16.mxu0 %v6620_v54  ;;  %5574 = vmatprep.subr.bf16.mxu1 %v5990_v30 }
 0x7aa   :  { %4271 = vmatprep.mubr.f32.mxu0 %v5989_v0  ;;  %5213 = vmatprep.mubr.msk.f32.mxu1 %vm5991_vm1, %v5989_v0 }
 0x7ac   :  { %5570 = vmatpush1.bf16.msra.mxu0 %v6637_v14  ;;  %5576 = vmatpush3.bf16.msra.mxu1 %v6639_v21 }
 0x7ad   :  { %5578 = vmatprep.subr.bf16.mxu0 %v6643_v16  ;;  %5585 = vmatprep.subr.bf16.mxu1 %v5990_v30 }
 0x862   :  { %v3763_v37 = vpop.f32.mrb[26].mxu0  ;;  %v3834_v54 = vpop.f32.mrb[50].mxu1 }
 0x863   :  { %v3838_v44 = vadd.f32 %v3763_v37, %v270_v39  ;;  %v3765_v42 = vpop.f32.mrb[27].mxu0  ;;  %v5182_v62 = vpop.f32.mrb[51].mxu1  ;;  %v3852_v32 = vadd.f32 %v6704_v60, %v3834_v54  ;;  %v5595_v37 = vpack.c.bf16 %v4538_v49, %v4537_v38 }
 0x864   :  { %v3839_v34 = vadd.f32 %v3765_v42, %v272_v61 }
 0x865   :  { %v4782_v43 = vmul.f32 -1.442695, %v3838_v44 }
 0x866   :  { %v4783_v14 = vmul.f32 -1.442695, %v3839_v34 }
 0x867   :  { %5808 = vpow2.f32 %v4782_v43 }
 0x868   :  { %5810 = vpow2.f32 %v4783_v14 }
 0x86a   :  { %v4009_v21 = vpop.f32.mrb[52].mxu1 }
 0x86b   :  { %v5193_v26 = vpop.f32.mrb[53].mxu1  ;;  %v4010_v6 = vadd.f32 %v4009_v21, %v6399_v50 }
 0x871   :  { %v5809_v16 = vpop.eup %5808 }
 0x872   :  { %v3846_v20 = vadd.f32 1.0, %v5809_v16  ;;  %v5811_v13 = vpop.eup %5810 }
 0x873   :  { %v3847_v46 = vadd.f32 1.0, %v5811_v13 }
 0x874   :  { %5812 = vrcp.f32 %v3846_v20 }
 0x875   :  { %5814 = vrcp.f32 %v3847_v46 }
 0x87a   :  { %v4094_v63 = vpop.f32.mrb[28].mxu0  ;;  %v4165_v31 = vpop.f32.mrb[54].mxu1 }
 0x87b   :  { %v5633_v47 = vadd.f32 %v4094_v63, %v6375_v10  ;;  %v4096_v5 = vpop.f32.mrb[29].mxu0  ;;  %v5204_v58 = vpop.f32.mrb[55].mxu1 }
 0x87c   :  { %v5634_v48 = vadd.f32 %v4096_v5, %v6379_v18 }
 0x87d   :  { %v4788_v59 = vmul.f32 -1.442695, %v5633_v47 }
 0x87e   :  { %v5813_v33 = vpop.eup %5812  ;;  %v4789_v53 = vmul.f32 -1.442695, %v5634_v48 }
 0x87f   :  { %v3853_v2 = vmul.f32 %v5813_v33, %v3852_v32  ;;  %5816 = vpow2.f32 %v4788_v59  ;;  %v5815_v56 = vpop.eup %5814 }
 0x880   :  { %v3856_v9 = vsub.f32 1.0, %v5815_v56  ;;  %v3858_v60 = vmul.f32 %v5815_v56, %v6771_v45  ;;  %v4183_v45 = vadd.f32 %v6784_v27, %v4165_v31 }
 0x881   :  { %v3854_v4 = vadd.f32 %v3853_v2, %v6255_v1 }
 0x883   :  { %5818 = vtanh.f32 %v3854_v4 }
 0x884   :  { %5820 = vpow2.f32 %v4789_v53 }
 0x889   :  { %v5817_v8 = vpop.eup %5816 }
 0x88a   :  { %v4177_v19 = vadd.f32 1.0, %v5817_v8 }
 0x88c   :  { %5822 = vrcp.f32 %v4177_v19 }
 0x88d   :  { %v5819_v41 = vpop.eup %5818 }
 0x88e   :  { %v3857_v3 = vmul.f32 %v5819_v41, %v3856_v9  ;;  %v5821_v25 = vpop.eup %5820 }
 0x88f   :  { %v4178_v1 = vadd.f32 1.0, %v5821_v25 }
 0x890   :  { %v3859_v23 = vadd.f32 %v3858_v60, %v3857_v3 }
 0x891   :  { %5824 = vrcp.f32 %v4178_v1 }
 0x892   :  { %4790 = vmatmul.mubr.msk.f32.vlgmr.msra.gmra.mrb[30].mxu0 %vm449_vm2, %v3859_v23  ;;  %5214 = vmatmul.mubr.msk.f32.vlgmr.msra.gmra.mrb[56].mxu1 %vm449_vm2, %v3859_v23 }
 0x893   :  { %5580 = vmatpush1.bf16.msra.mxu0 %v6649_v51  ;;  %5587 = vmatpush3.bf16.msra.mxu1 %v6655_v11 }
 0x894   :  { %5582 = vmatprep.subr.bf16.mxu0 %v6659_v15  ;;  %5588 = vmatprep.subr.bf16.mxu1 %v5990_v30 }
 0x895   :  { %4427 = vmatprep.mubr.f32.mxu0 %v5989_v0  ;;  %5224 = vmatprep.mubr.msk.f32.mxu1 %vm5991_vm1, %v5989_v0 }
 0x896   :  { %v5823_v35 = vpop.eup %5822 }
 0x897   :  { %v4184_v57 = vmul.f32 %v5823_v35, %v4183_v45  ;;  %5584 = vmatpush1.bf16.msra.mxu0 %v6667_v12  ;;  %5590 = vmatpush3.bf16.msra.mxu1 %v6669_v28 }
 0x898   :  { %5592 = vmatprep.subr.bf16.mxu0 %v5591_v24 }
 0x899   :  { %v4185_v51 = vadd.f32 %v4184_v57, %v4010_v6 }
 0x89b   :  { %5826 = vtanh.f32 %v4185_v51  ;;  %v5825_v30 = vpop.eup %5824 }
 0x89c   :  { %v4187_v11 = vsub.f32 1.0, %v5825_v30  ;;  %v4189_v0 = vmul.f32 %v5825_v30, %v6811_v29 }
 0x8a5   :  { %v5827_v15 = vpop.eup %5826 }
 0x8a6   :  { %v4188_v39 = vmul.f32 %v5827_v15, %v4187_v11 }
 0x8a8   :  { %v4190_v61 = vadd.f32 %v4189_v0, %v4188_v39 }
 0x8aa   :  { %4792 = vmatmul.mubr.msk.f32.vlgmr.msra.gmra.mrb[30].mxu0 %vm449_vm2, %v4190_v61  ;;  %5225 = vmatmul.mubr.msk.f32.vlgmr.msra.gmra.mrb[58].mxu1 %vm449_vm2, %v4190_v61 }
 0x8ab   :  { %5594 = vmatpush3.bf16.msra.mxu0 %v5591_v24  ;;  %5235 = vmatprep.mubr.msk.f32.mxu0 %vm449_vm2, %v6429_v22 }
 0x8ac   :  { %5596 = vmatprep.subr.bf16.mxu0 %v5595_v37 }
 0x8af   :  { %5598 = vmatpush3.bf16.msra.mxu0 %v5595_v37 }
 0x8b2   :  { %5236 = vmatmul.mubr.msk.f32.vlgmr.msra.gmra.mrb[32].mxu0 %vm449_vm2, %v6487_v52 }
 0x8b3   :  { %5238 = vmatprep.mubr.msk.f32.mxu0 %vm449_vm2, %v6555_v17 }
 0x8b6   :  { %5239 = vmatmul.mubr.msk.f32.gmra.mrb[34].mxu0 %vm449_vm2, %v6681_v40  ;;  %v4796_v40 = vld [vmem:[%s6899_s10] ss:$0 sm:$0xff]  ;;  %s5992_s10 = smov [#allocation13]  }
 0x8b7   :  { %5241 = vmatprep.mubr.msk.f32.mxu0 %vm449_vm2, %v6745_v7  ;;  %s4688_s2 = sshll.u32 %s5992_s10, 4  ;;  %s4689_s2 = int_to_ptr.vmem [resolvable:$true] %s4688_s2 }
 0x8b8   :  { %s5950_s18 = scalar_lea.vmem %s4689_s2, 1024  ;;  %p5955_p13 = scmp.lt.s32.totalorder %s4689_s2, %s4689_s2 }
 0x8b9   :  { %p5951_p12 = scmp.ne.s32.totalorder %s4689_s2, %s5950_s18  ;;  %p5956_p0 = scmp.lt.s32.totalorder %s5950_s18, %s5950_s18 }
 0x8ba   :  { %5242 = vmatmul.mubr.msk.f32.gmra.mrb[36].mxu0 %vm449_vm2, %v6811_v29 }
 0x8bb   :  { %5244 = vmatprep.mubr.msk.f32.mxu0 %vm449_vm2, %v4190_v61  ;;  %p5957_p1 = por %p5956_p0, %p5955_p13 }
 0x8bd   :  { %p5958_p2 = pnand %p5957_p1, %p5951_p12 }
 0x965   :  { %v4344_v22 = vpop.f32.mrb[56].mxu1 }
 0x966   :  { %v5215_v12 = vpop.f32.mrb[57].mxu1  ;;  %v4345_v59 = vadd.f32 %v4344_v22, %v6399_v50 }
 0x97d   :  { %v4429_v28 = vpop.f32.mrb[30].mxu0  ;;  %v4500_v54 = vpop.f32.mrb[58].mxu1 }
 0x97e   :  { %v5635_v52 = vadd.f32 %v4429_v28, %v6375_v10  ;;  %v4431_v44 = vpop.f32.mrb[31].mxu0  ;;  %v5226_v42 = vpop.f32.mrb[59].mxu1  ;;  %v4518_v58 = vadd.f32 %v6784_v27, %v4500_v54 }
 0x97f   :  { %v5636_v62 = vadd.f32 %v4431_v44, %v6379_v18 }
 0x980   :  { %v4794_v17 = vmul.f32 -1.442695, %v5635_v52 }
 0x981   :  { %v4795_v7 = vmul.f32 -1.442695, %v5636_v62 }
 0x982   :  { %5828 = vpow2.f32 %v4794_v17 }
 0x983   :  { %5830 = vpow2.f32 %v4795_v7 }
 0x985   :  { %v5237_v29 = vpop.f32.mrb[32].mxu0 }
 0x986   :  { %v4642_v34 = vadd.f32 %v5237_v29, %v4796_v40  ;;  %v4636_v43 = vpop.f32.mrb[33].mxu0 }
 0x987   :  { %v4637_v14 = vadd.f32 %v4796_v40, %v4636_v43 }
 0x988   :  { %4676 = vst [vmem:[#allocation13 + $0x8] sm:$0xff] %v4642_v34 }
 0x989   :  { %4675 = vst [vmem:[#allocation13] sm:$0xff] %v4637_v14  ;;  %v5240_v21 = vpop.f32.mrb[34].mxu0 }
 0x98a   :  { %v4652_v10 = vadd.f32 %v5240_v21, %v4796_v40  ;;  %v4646_v26 = vpop.f32.mrb[35].mxu0 }
 0x98b   :  { %v4647_v16 = vadd.f32 %v4796_v40, %v4646_v26 }
 0x98c   :  { %v5829_v20 = vpop.eup %5828  ;;  %4678 = vst [vmem:[#allocation13 + $0x18] sm:$0xff] %v4652_v10 }
 0x98d   :  { %v4512_v18 = vadd.f32 1.0, %v5829_v20  ;;  %4677 = vst [vmem:[#allocation13 + $0x10] sm:$0xff] %v4647_v16  ;;  %v5243_v13 = vpop.f32.mrb[36].mxu0  ;;  %v5831_v47 = vpop.eup %5830 }
 0x98e   :  { %v4662_v46 = vadd.f32 %v5243_v13, %v4796_v40  ;;  %v4656_v63 = vpop.f32.mrb[37].mxu0  ;;  %v4513_v5 = vadd.f32 1.0, %v5831_v47 }
 0x98f   :  { %5832 = vrcp.f32 %v4512_v18  ;;  %v4657_v31 = vadd.f32 %v4796_v40, %v4656_v63 }
 0x990   :  { %4680 = vst [vmem:[#allocation13 + $0x28] sm:$0xff] %v4662_v46  ;;  %5834 = vrcp.f32 %v4513_v5 }
 0x991   :  { %4679 = vst [vmem:[#allocation13 + $0x20] sm:$0xff] %v4657_v31 }
 0x999   :  { %v5833_v32 = vpop.eup %5832 }
 0x99a   :  { %v4519_v33 = vmul.f32 %v5833_v32, %v4518_v58  ;;  %v5835_v2 = vpop.eup %5834 }
 0x99b   :  { %v4522_v4 = vsub.f32 1.0, %v5835_v2  ;;  %v4524_v8 = vmul.f32 %v5835_v2, %v4190_v61 }
 0x99c   :  { %v4520_v48 = vadd.f32 %v4519_v33, %v4345_v59 }
 0x99e   :  { %5836 = vtanh.f32 %v4520_v48 }
 0x9a8   :  { %v5837_v53 = vpop.eup %5836 }
 0x9a9   :  { %v4523_v56 = vmul.f32 %v5837_v53, %v4522_v4 }
 0x9ab   :  { %v4525_v19 = vadd.f32 %v4524_v8, %v4523_v56 }
 0x9ad   :  { %5245 = vmatmul.mubr.msk.f32.gmra.mrb[38].mxu0 %vm449_vm2, %v4525_v19 }
 0xa80   :  { %v5246_v9 = vpop.f32.mrb[38].mxu0 }
 0xa81   :  { %v4672_v41 = vadd.f32 %v5246_v9, %v4796_v40  ;;  %v4666_v27 = vpop.f32.mrb[39].mxu0 }
 0xa82   :  { %v4667_v3 = vadd.f32 %v4796_v40, %v4666_v27 }
 0xa83   :  { %4682 = vst [vmem:[#allocation13 + $0x38] sm:$0xff] %v4672_v41 }
 0xa84   :  { %4681 = vst [vmem:[#allocation13 + $0x30] sm:$0xff] %v4667_v3 }
 0xa85   :  { %5961 = shalt.err (!%p5958_p2)
}
 0xa86   :  { %s5962_s28 = scalar_lea.hbm %s6900_s11, 1024 }
 0xa87   :  { %p5963_p3 = scmp.ne.s32.totalorder %s6900_s11, %s5962_s28  ;;  %p5966_p4 = scmp.lt.u32.totalorder %s5962_s28, %s6900_s11 }
 0xa89   :  { %p5968_p5 = pnand %p5966_p4, %p5963_p3 }
 0xa8b   :  { %5971 = shalt.err (!%p5968_p5)
}
 0xa8c   :  { %4694 = dma.vmem_to_hbm [thread:$0]  %s4689_s2, 1024, %s6900_s11, [#allocation6], %s5987_s3, %s5987_s3, %s5988_s27  }
 0xa8d   :  { %5978 = dma.done.wait [#allocation6], 1024  }
 0xa8e   :  { %5979 = vsyncadd [#allocation6], 4294966272 }
 0xa8f   :  { %4698 = vsyncpa [#allocation5], 1 }
 0xa90   :  { %4699 = vsyncpa [#allocation8], 1 }
 0xa91   :  { %4700 = vsyncpa [#allocation11], 1 }
 0xa92   :  { %4701 = vsyncpa [#allocation6], 1 }

</bundles_post_ra>
